<compile_context>
chip_gen: v7x
topology: tpu7x:2x2x1
jax: 0.10.0
libtpu: 0.0.40
codegen_flags: <defaults>
</compile_context>

<pallas_src>
import functools

import jax
import jax.numpy as jnp
import numpy as np
from jax.experimental import pallas as pl
from jax.experimental.pallas import tpu as pltpu


def _sigmoid(v):
    # tanh runs on the EUP (its own VLIW slot); avoids a full-rate VPU divide.
    return 0.5 * jnp.tanh(0.5 * v) + 0.5


def _tree_sum(terms):
    terms = list(terms)
    while len(terms) > 1:
        nxt = [terms[i] + terms[i + 1] for i in range(0, len(terms) - 1, 2)]
        if len(terms) % 2:
            nxt.append(terms[-1])
        terms = nxt
    return terms[0]


def _cbam_kernel(x_ref, w1t_ref, b1_ref, w2_ref, b2_ref, wsl_ref, mask_ref,
                 bsa_ref, o_ref, slab_ref, *, H, W, KS, NB, SUB):
    """Processes NB batch elements per grid step.

    x_ref / o_ref : (NB, C, H*W)   lane-dense feature maps
    w1t_ref       : (C, Cr)        1x1 conv #1 weight, transposed
    b1_ref        : (1, Cr)
    w2_ref        : (C, Cr)        1x1 conv #2 weight
    b2_ref        : (C, 1)
    wsl_ref       : (KS, SUB, 1)   7x7 weights: row dh, sublane 2*dw + m
    mask_ref      : (2*KS, H*W)    rows [0,KS): column masks, [KS,2KS): row masks
    bsa_ref       : (1,) f32 SMEM  7x7 conv bias
    slab_ref      : (SUB, H*W) f32 VMEM scratch for the stacked conv input
    """
    HW = H * W
    P = KS // 2
    bias = bsa_ref[0]

    # Padded sublanes have zero weights, but clear them once so uninitialized
    # VMEM (possibly NaN) cannot leak through 0 * NaN.
    if SUB > 2 * KS:
        slab_ref[pl.ds(2 * KS, SUB - 2 * KS), :] = jnp.zeros(
            (SUB - 2 * KS, HW), jnp.float32)

    for b in range(NB):
        x = x_ref[b].astype(jnp.float32)                         # (C, HW)

        # ---- channel attention: GAP -> 1x1 -> ReLU -> 1x1 -> sigmoid -------
        gap = jnp.mean(x, axis=1, keepdims=True)                 # (C, 1)
        h = jnp.sum(w1t_ref[...] * gap, axis=0, keepdims=True) + b1_ref[...]
        h = jnp.maximum(h, 0.0)                                  # (1, Cr)
        ca = _sigmoid(jnp.sum(w2_ref[...] * h, axis=1, keepdims=True)
                      + b2_ref[...])                             # (C, 1)
        x_ca = x * ca                                            # (C, HW)

        # ---- spatial attention: channel mean/max -> 7x7 SAME conv ----------
        avg_map = jnp.mean(x_ca, axis=0, keepdims=True)          # (1, HW)
        max_map = jnp.max(x_ca, axis=0, keepdims=True)           # (1, HW)

        # Build the (SUB, HW) column-shifted slab: sublane 2*dw + m holds
        # map_m shifted by ow = dw - P with the column mask folded in as a
        # 0/1 multiply.  ow == 0 is the raw [avg; max] pair.
        slab_ref[pl.ds(2 * P, 1), :] = avg_map
        slab_ref[pl.ds(2 * P + 1, 1), :] = max_map
        pair0 = slab_ref[pl.ds(2 * P, 2), :]                     # (2, HW)
        for dw in range(KS):
            ow = dw - P
            if ow == 0:
                continue
            slab_ref[pl.ds(2 * dw, 2), :] = (
                pltpu.roll(pair0, shift=(-ow) % HW, axis=1)
                * mask_ref[dw:dw + 1, :])
        slab = slab_ref[...]                                     # (SUB, HW)

        # One lane roll + per-sublane weight broadcast + sublane reduce +
        # row-mask multiply per output row offset dh.
        partials = []
        for dh in range(KS):
            oh = dh - P
            rolled = slab if oh == 0 else pltpu.roll(
                slab, shift=(-oh * W) % HW, axis=1)
            red = jnp.sum(rolled * wsl_ref[dh], axis=0, keepdims=True)
            if oh != 0:
                red = red * mask_ref[KS + dh:KS + dh + 1, :]
            partials.append(red)                                 # (1, HW)
        sa = _sigmoid(_tree_sum(partials) + bias)                # (1, HW)

        o_ref[b] = (x_ca * sa).astype(o_ref.dtype)               # unmasked stores


def _pick_batch_per_step(N, C, HW, requested=None):
    """Whole batch per grid step on single-TC chips; one element/step on v7x."""
    if requested is None:
        try:
            kind = jax.devices()[0].device_kind.lower()
        except Exception:
            kind = ""
        requested = 1 if "v7" in kind else N
    nb = max(1, min(int(requested), N))
    # Keep the double-buffered in+out working set comfortably inside VMEM.
    while nb > 1 and nb * C * HW * 4 * 4 > (8 << 20):
        nb -= 1
    while N % nb:
        nb -= 1
    return nb


def cbam_pallas(x, params, batch_per_step=None):
    """x: (N, C, H, W) float32.  params: (w1, b1, w2, b2, w_sa, b_sa)."""
    N, C, H, W = x.shape
    w1, b1, w2, b2, w_sa, b_sa = params
    Cr = w1.shape[0]
    KS = w_sa.shape[-1]
    P = KS // 2
    HW = H * W
    SUB = ((2 * KS + 7) // 8) * 8            # 14 -> 16 sublanes

    NB = _pick_batch_per_step(N, C, HW, batch_per_step)

    # Lane-dense layout: free reshape of the contiguous NCHW array.
    x2 = x.reshape(N, C, HW)

    # Trace-time 0/1 validity masks for the SAME padding (H, W, KS static).
    jj = np.arange(HW) % W
    ii = np.arange(HW) // W
    col_masks = np.stack(
        [((jj + dw - P >= 0) & (jj + dw - P < W)) for dw in range(KS)], 0)
    row_masks = np.stack(
        [((ii + dh - P >= 0) & (ii + dh - P < H)) for dh in range(KS)], 0)
    masks = jnp.asarray(
        np.concatenate([col_masks, row_masks], 0).astype(np.float32))  # (2KS,HW)

    # 7x7 conv weights as a VMEM slab: row dh, sublane 2*dw + m (padded to SUB).
    w_perm = jnp.transpose(w_sa[0].astype(jnp.float32), (1, 2, 0))     # (KS,KS,2)
    w_slab = jnp.zeros((KS, SUB), jnp.float32).at[:, :2 * KS].set(
        w_perm.reshape(KS, 2 * KS))[:, :, None]                        # (KS,SUB,1)

    kernel = functools.partial(_cbam_kernel, H=H, W=W, KS=KS, NB=NB, SUB=SUB)
    out = pl.pallas_call(
        kernel,
        out_shape=jax.ShapeDtypeStruct((N, C, HW), x.dtype),
        grid=(N // NB,),
        in_specs=[
            pl.BlockSpec((NB, C, HW), lambda n: (n, 0, 0)),     # x
            pl.BlockSpec((C, Cr), lambda n: (0, 0)),            # w1.T
            pl.BlockSpec((1, Cr), lambda n: (0, 0)),            # b1
            pl.BlockSpec((C, Cr), lambda n: (0, 0)),            # w2
            pl.BlockSpec((C, 1), lambda n: (0, 0)),             # b2
            pl.BlockSpec((KS, SUB, 1), lambda n: (0, 0, 0)),    # 7x7 weights
            pl.BlockSpec((2 * KS, HW), lambda n: (0, 0)),       # padding masks
            pl.BlockSpec(memory_space=pltpu.MemorySpace.SMEM),  # 7x7 bias
        ],
        out_specs=pl.BlockSpec((NB, C, HW), lambda n: (n, 0, 0)),
        scratch_shapes=[pltpu.VMEM((SUB, HW), jnp.float32)],
        compiler_params=pltpu.CompilerParams(
            dimension_semantics=("parallel",)),   # batch blocks independent
    )(x2,
      w1.reshape(Cr, C).T.astype(jnp.float32),
      b1.reshape(1, Cr).astype(jnp.float32),
      w2.reshape(C, Cr).astype(jnp.float32),
      b2.reshape(C, 1).astype(jnp.float32),
      w_slab,
      masks,
      b_sa.reshape(1).astype(jnp.float32))
    return out.reshape(N, C, H, W)


def cbam_reference(x, params):
    """Pure-JAX reference matching the PyTorch module semantics."""
    w1, b1, w2, b2, w_sa, b_sa = params
    N, C, H, W = x.shape
    Cr = w1.shape[0]
    gap = jnp.mean(x, axis=(2, 3))                                  # (N, C)
    h = jax.nn.relu(gap @ w1.reshape(Cr, C).T + b1.reshape(-1))     # (N, Cr)
    ca = jax.nn.sigmoid(h @ w2.reshape(C, Cr).T + b2.reshape(-1))   # (N, C)
    x_ca = x * ca[:, :, None, None]
    avg_out = jnp.mean(x_ca, axis=1, keepdims=True)
    max_out = jnp.max(x_ca, axis=1, keepdims=True)
    sa_in = jnp.concatenate([avg_out, max_out], axis=1)             # (N, 2, H, W)
    sa = jax.lax.conv_general_dilated(
        sa_in, w_sa, window_strides=(1, 1), padding="SAME",
        dimension_numbers=("NCHW", "OIHW", "NCHW"))
    sa = jax.nn.sigmoid(sa + b_sa.reshape(1, 1, 1, 1))
    return x_ca * sa


def init_params(key, channels, reduction=16):
    Cr = max(channels // reduction, 1)
    k1, k2, k3, k4, k5, k6 = jax.random.split(key, 6)
    w1 = 0.1 * jax.random.normal(k1, (Cr, channels), jnp.float32)    # 1x1 conv C->Cr
    b1 = 0.1 * jax.random.normal(k2, (Cr,), jnp.float32)
    w2 = 0.1 * jax.random.normal(k3, (channels, Cr), jnp.float32)    # 1x1 conv Cr->C
    b2 = 0.1 * jax.random.normal(k4, (channels,), jnp.float32)
    w_sa = 0.1 * jax.random.normal(k5, (1, 2, 7, 7), jnp.float32)    # 7x7 conv, 2->1
    b_sa = 0.1 * jax.random.normal(k6, (1,), jnp.float32)
    return (w1, b1, w2, b2, w_sa, b_sa)


if __name__ == "__main__":
    N, C, H, W = 2, 32, 16, 16          # channels=32, reduction=16 -> hidden=2
    key = jax.random.PRNGKey(0)
    kx, kp = jax.random.split(key)
    x = jax.random.normal(kx, (N, C, H, W), jnp.float32)
    params = init_params(kp, C, reduction=16)

    out = cbam_pallas(x, params)
    out = jax.block_until_ready(out)

    ref = cbam_reference(x, params)
    np.testing.assert_allclose(np.asarray(out), np.asarray(ref),
                               rtol=1e-4, atol=1e-4)
    print("KERNEL_OK")
</pallas_src>

<mosaic_0001>
module attributes {stable_mosaic.version = 11 : i64} {
  func.func @_cbam_kernel(%arg0: i32, %arg1: memref<2x32x256xf32, #tpu.memory_space<vmem>>, %arg2: memref<32x2xf32, #tpu.memory_space<vmem>>, %arg3: memref<1x2xf32, #tpu.memory_space<vmem>>, %arg4: memref<32x2xf32, #tpu.memory_space<vmem>>, %arg5: memref<32x1xf32, #tpu.memory_space<vmem>>, %arg6: memref<7x16x1xf32, #tpu.memory_space<vmem>>, %arg7: memref<14x256xf32, #tpu.memory_space<vmem>>, %arg8: memref<1xf32, #tpu.memory_space<smem>>, %arg9: memref<2x32x256xf32, #tpu.memory_space<vmem>>, %arg10: memref<16x256xf32, #tpu.memory_space<vmem>>) attributes {dimension_semantics = [#tpu.dimension_semantics<parallel>], iteration_bounds = array<i64: 1>, scalar_prefetch = 0 : i64, scratch_operands = 1 : i64, tpu.core_type = #tpu.core_type<tc>, window_params = [{transform_indices = @transform_0, window_bounds = array<i64: 2, 32, 256>}, {pipeline_mode = #tpu.pipeline_mode<synchronous>, transform_indices = @transform_1, window_bounds = array<i64: 32, 2>}, {pipeline_mode = #tpu.pipeline_mode<synchronous>, transform_indices = @transform_2, window_bounds = array<i64: 1, 2>}, {pipeline_mode = #tpu.pipeline_mode<synchronous>, transform_indices = @transform_3, window_bounds = array<i64: 32, 2>}, {pipeline_mode = #tpu.pipeline_mode<synchronous>, transform_indices = @transform_4, window_bounds = array<i64: 32, 1>}, {pipeline_mode = #tpu.pipeline_mode<synchronous>, transform_indices = @transform_5, window_bounds = array<i64: 7, 16, 1>}, {pipeline_mode = #tpu.pipeline_mode<synchronous>, transform_indices = @transform_6, window_bounds = array<i64: 14, 256>}, {transform_indices = @transform_7, window_bounds = array<i64: 1>}, {transform_indices = @transform_8, window_bounds = array<i64: 2, 32, 256>}]} {
    %c0 = arith.constant 0 : index
    %0 = memref.load %arg8[%c0] : memref<1xf32, #tpu.memory_space<smem>>
    %cst = arith.constant 0.000000e+00 : f32
    %1 = vector.broadcast %cst : f32 to vector<2x256xf32>
    %c14 = arith.constant 14 : index
    %c0_0 = arith.constant 0 : index
    %2 = vector.load %arg10[%c14, %c0_0] : memref<16x256xf32, #tpu.memory_space<vmem>>, vector<2x256xf32>
    tpu.vector_store %arg10[%c14, %c0_0], %1 {strides = array<i32>} : memref<16x256xf32, #tpu.memory_space<vmem>>, vector<2x256xf32>,
    %c0_1 = arith.constant 0 : index
    %c0_2 = arith.constant 0 : index
    %c0_3 = arith.constant 0 : index
    %3 = vector.load %arg1[%c0_1, %c0_2, %c0_3] : memref<2x32x256xf32, #tpu.memory_space<vmem>>, vector<1x32x256xf32>
    %4 = vector.shape_cast %3 : vector<1x32x256xf32> to vector<32x256xf32>
    %cst_4 = arith.constant dense<0.000000e+00> : vector<32xf32>
    %5 = vector.multi_reduction <add>, %4, %cst_4 [1] : vector<32x256xf32> to vector<32xf32>
    %6 = vector.shape_cast %5 : vector<32xf32> to vector<32x1xf32>
    %cst_5 = arith.constant 2.560000e+02 : f32
    %7 = vector.broadcast %cst_5 : f32 to vector<32x1xf32>
    %8 = arith.divf %6, %7 : vector<32x1xf32>
    %c0_6 = arith.constant 0 : index
    %c0_7 = arith.constant 0 : index
    %9 = vector.load %arg2[%c0_6, %c0_7] : memref<32x2xf32, #tpu.memory_space<vmem>>, vector<32x2xf32>
    %10 = vector.broadcast %8 : vector<32x1xf32> to vector<32x2xf32>
    %11 = arith.mulf %9, %10 : vector<32x2xf32>
    %cst_8 = arith.constant dense<0.000000e+00> : vector<2xf32>
    %12 = vector.multi_reduction <add>, %11, %cst_8 [0] : vector<32x2xf32> to vector<2xf32>
    %13 = vector.shape_cast %12 : vector<2xf32> to vector<1x2xf32>
    %c0_9 = arith.constant 0 : index
    %c0_10 = arith.constant 0 : index
    %14 = vector.load %arg3[%c0_9, %c0_10] : memref<1x2xf32, #tpu.memory_space<vmem>>, vector<1x2xf32>
    %15 = arith.addf %13, %14 : vector<1x2xf32>
    %cst_11 = arith.constant 0.000000e+00 : f32
    %16 = vector.broadcast %cst_11 : f32 to vector<1x2xf32>
    %17 = arith.maximumf %15, %16 : vector<1x2xf32>
    %c0_12 = arith.constant 0 : index
    %c0_13 = arith.constant 0 : index
    %18 = vector.load %arg4[%c0_12, %c0_13] : memref<32x2xf32, #tpu.memory_space<vmem>>, vector<32x2xf32>
    %19 = vector.broadcast %17 : vector<1x2xf32> to vector<32x2xf32>
    %20 = arith.mulf %18, %19 : vector<32x2xf32>
    %cst_14 = arith.constant dense<0.000000e+00> : vector<32xf32>
    %21 = vector.multi_reduction <add>, %20, %cst_14 [1] : vector<32x2xf32> to vector<32xf32>
    %22 = vector.shape_cast %21 : vector<32xf32> to vector<32x1xf32>
    %c0_15 = arith.constant 0 : index
    %c0_16 = arith.constant 0 : index
    %23 = vector.load %arg5[%c0_15, %c0_16] : memref<32x1xf32, #tpu.memory_space<vmem>>, vector<32x1xf32>
    %24 = arith.addf %22, %23 : vector<32x1xf32>
    %cst_17 = arith.constant 5.000000e-01 : f32
    %25 = vector.broadcast %cst_17 : f32 to vector<32x1xf32>
    %26 = arith.mulf %25, %24 : vector<32x1xf32>
    %27 = math.tanh %26 : vector<32x1xf32>
    %cst_18 = arith.constant 5.000000e-01 : f32
    %28 = vector.broadcast %cst_18 : f32 to vector<32x1xf32>
    %29 = arith.mulf %28, %27 : vector<32x1xf32>
    %cst_19 = arith.constant 5.000000e-01 : f32
    %30 = vector.broadcast %cst_19 : f32 to vector<32x1xf32>
    %31 = arith.addf %29, %30 : vector<32x1xf32>
    %32 = vector.broadcast %31 : vector<32x1xf32> to vector<32x256xf32>
    %33 = arith.mulf %4, %32 : vector<32x256xf32>
    %cst_20 = arith.constant dense<0.000000e+00> : vector<256xf32>
    %34 = vector.multi_reduction <add>, %33, %cst_20 [0] : vector<32x256xf32> to vector<256xf32>
    %35 = vector.shape_cast %34 : vector<256xf32> to vector<1x256xf32>
    %cst_21 = arith.constant 3.200000e+01 : f32
    %36 = vector.broadcast %cst_21 : f32 to vector<1x256xf32>
    %37 = arith.divf %35, %36 : vector<1x256xf32>
    %cst_22 = arith.constant dense<0xFF800000> : vector<256xf32>
    %38 = vector.multi_reduction <maximumf>, %33, %cst_22 [0] : vector<32x256xf32> to vector<256xf32>
    %39 = vector.shape_cast %38 : vector<256xf32> to vector<1x256xf32>
    %c6 = arith.constant 6 : index
    %c0_23 = arith.constant 0 : index
    %40 = vector.load %arg10[%c6, %c0_23] : memref<16x256xf32, #tpu.memory_space<vmem>>, vector<1x256xf32>
    tpu.vector_store %arg10[%c6, %c0_23], %37 {strides = array<i32>} : memref<16x256xf32, #tpu.memory_space<vmem>>, vector<1x256xf32>,
    %c7 = arith.constant 7 : index
    %c0_24 = arith.constant 0 : index
    %41 = vector.load %arg10[%c7, %c0_24] : memref<16x256xf32, #tpu.memory_space<vmem>>, vector<1x256xf32>
    tpu.vector_store %arg10[%c7, %c0_24], %39 {strides = array<i32>} : memref<16x256xf32, #tpu.memory_space<vmem>>, vector<1x256xf32>,
    %c6_25 = arith.constant 6 : index
    %c0_26 = arith.constant 0 : index
    %42 = vector.load %arg10[%c6_25, %c0_26] : memref<16x256xf32, #tpu.memory_space<vmem>>, vector<2x256xf32>
    %c3_i32 = arith.constant 3 : i32
    %43 = tpu.dynamic_rotate %42 by %c3_i32 dim 1 : vector<2x256xf32>, i32 -> vector<2x256xf32>
    %c0_27 = arith.constant 0 : index
    %c0_28 = arith.constant 0 : index
    %44 = vector.load %arg7[%c0_27, %c0_28] : memref<14x256xf32, #tpu.memory_space<vmem>>, vector<1x256xf32>
    %45 = vector.broadcast %44 : vector<1x256xf32> to vector<2x256xf32>
    %46 = arith.mulf %43, %45 : vector<2x256xf32>
    %c0_29 = arith.constant 0 : index
    %c0_30 = arith.constant 0 : index
    %47 = vector.load %arg10[%c0_29, %c0_30] : memref<16x256xf32, #tpu.memory_space<vmem>>, vector<2x256xf32>
    tpu.vector_store %arg10[%c0_29, %c0_30], %46 {strides = array<i32>} : memref<16x256xf32, #tpu.memory_space<vmem>>, vector<2x256xf32>,
    %c2_i32 = arith.constant 2 : i32
    %48 = tpu.dynamic_rotate %42 by %c2_i32 dim 1 : vector<2x256xf32>, i32 -> vector<2x256xf32>
    %c1 = arith.constant 1 : index
    %c0_31 = arith.constant 0 : index
    %49 = vector.load %arg7[%c1, %c0_31] : memref<14x256xf32, #tpu.memory_space<vmem>>, vector<1x256xf32>
    %50 = vector.broadcast %49 : vector<1x256xf32> to vector<2x256xf32>
    %51 = arith.mulf %48, %50 : vector<2x256xf32>
    %c2 = arith.constant 2 : index
    %c0_32 = arith.constant 0 : index
    %52 = vector.load %arg10[%c2, %c0_32] : memref<16x256xf32, #tpu.memory_space<vmem>>, vector<2x256xf32>
    tpu.vector_store %arg10[%c2, %c0_32], %51 {strides = array<i32>} : memref<16x256xf32, #tpu.memory_space<vmem>>, vector<2x256xf32>,
    %c1_i32 = arith.constant 1 : i32
    %53 = tpu.dynamic_rotate %42 by %c1_i32 dim 1 : vector<2x256xf32>, i32 -> vector<2x256xf32>
    %c2_33 = arith.constant 2 : index
    %c0_34 = arith.constant 0 : index
    %54 = vector.load %arg7[%c2_33, %c0_34] : memref<14x256xf32, #tpu.memory_space<vmem>>, vector<1x256xf32>
    %55 = vector.broadcast %54 : vector<1x256xf32> to vector<2x256xf32>
    %56 = arith.mulf %53, %55 : vector<2x256xf32>
    %c4 = arith.constant 4 : index
    %c0_35 = arith.constant 0 : index
    %57 = vector.load %arg10[%c4, %c0_35] : memref<16x256xf32, #tpu.memory_space<vmem>>, vector<2x256xf32>
    tpu.vector_store %arg10[%c4, %c0_35], %56 {strides = array<i32>} : memref<16x256xf32, #tpu.memory_space<vmem>>, vector<2x256xf32>,
    %c255_i32 = arith.constant 255 : i32
    %58 = tpu.dynamic_rotate %42 by %c255_i32 dim 1 : vector<2x256xf32>, i32 -> vector<2x256xf32>
    %c4_36 = arith.constant 4 : index
    %c0_37 = arith.constant 0 : index
    %59 = vector.load %arg7[%c4_36, %c0_37] : memref<14x256xf32, #tpu.memory_space<vmem>>, vector<1x256xf32>
    %60 = vector.broadcast %59 : vector<1x256xf32> to vector<2x256xf32>
    %61 = arith.mulf %58, %60 : vector<2x256xf32>
    %c8 = arith.constant 8 : index
    %c0_38 = arith.constant 0 : index
    %62 = vector.load %arg10[%c8, %c0_38] : memref<16x256xf32, #tpu.memory_space<vmem>>, vector<2x256xf32>
    tpu.vector_store %arg10[%c8, %c0_38], %61 {strides = array<i32>} : memref<16x256xf32, #tpu.memory_space<vmem>>, vector<2x256xf32>,
    %c254_i32 = arith.constant 254 : i32
    %63 = tpu.dynamic_rotate %42 by %c254_i32 dim 1 : vector<2x256xf32>, i32 -> vector<2x256xf32>
    %c5 = arith.constant 5 : index
    %c0_39 = arith.constant 0 : index
    %64 = vector.load %arg7[%c5, %c0_39] : memref<14x256xf32, #tpu.memory_space<vmem>>, vector<1x256xf32>
    %65 = vector.broadcast %64 : vector<1x256xf32> to vector<2x256xf32>
    %66 = arith.mulf %63, %65 : vector<2x256xf32>
    %c10 = arith.constant 10 : index
    %c0_40 = arith.constant 0 : index
    %67 = vector.load %arg10[%c10, %c0_40] : memref<16x256xf32, #tpu.memory_space<vmem>>, vector<2x256xf32>
    tpu.vector_store %arg10[%c10, %c0_40], %66 {strides = array<i32>} : memref<16x256xf32, #tpu.memory_space<vmem>>, vector<2x256xf32>,
    %c253_i32 = arith.constant 253 : i32
    %68 = tpu.dynamic_rotate %42 by %c253_i32 dim 1 : vector<2x256xf32>, i32 -> vector<2x256xf32>
    %c6_41 = arith.constant 6 : index
    %c0_42 = arith.constant 0 : index
    %69 = vector.load %arg7[%c6_41, %c0_42] : memref<14x256xf32, #tpu.memory_space<vmem>>, vector<1x256xf32>
    %70 = vector.broadcast %69 : vector<1x256xf32> to vector<2x256xf32>
    %71 = arith.mulf %68, %70 : vector<2x256xf32>
    %c12 = arith.constant 12 : index
    %c0_43 = arith.constant 0 : index
    %72 = vector.load %arg10[%c12, %c0_43] : memref<16x256xf32, #tpu.memory_space<vmem>>, vector<2x256xf32>
    tpu.vector_store %arg10[%c12, %c0_43], %71 {strides = array<i32>} : memref<16x256xf32, #tpu.memory_space<vmem>>, vector<2x256xf32>,
    %c0_44 = arith.constant 0 : index
    %c0_45 = arith.constant 0 : index
    %73 = vector.load %arg10[%c0_44, %c0_45] : memref<16x256xf32, #tpu.memory_space<vmem>>, vector<16x256xf32>
    %c48_i32 = arith.constant 48 : i32
    %74 = tpu.dynamic_rotate %73 by %c48_i32 dim 1 : vector<16x256xf32>, i32 -> vector<16x256xf32>
    %c0_46 = arith.constant 0 : index
    %c0_47 = arith.constant 0 : index
    %c0_48 = arith.constant 0 : index
    %75 = vector.load %arg6[%c0_46, %c0_47, %c0_48] : memref<7x16x1xf32, #tpu.memory_space<vmem>>, vector<1x16x1xf32>
    %76 = vector.shape_cast %75 : vector<1x16x1xf32> to vector<16x1xf32>
    %77 = vector.broadcast %76 : vector<16x1xf32> to vector<16x256xf32>
    %78 = arith.mulf %74, %77 : vector<16x256xf32>
    %cst_49 = arith.constant dense<0.000000e+00> : vector<256xf32>
    %79 = vector.multi_reduction <add>, %78, %cst_49 [0] : vector<16x256xf32> to vector<256xf32>
    %80 = vector.shape_cast %79 : vector<256xf32> to vector<1x256xf32>
    %c7_50 = arith.constant 7 : index
    %c0_51 = arith.constant 0 : index
    %81 = vector.load %arg7[%c7_50, %c0_51] : memref<14x256xf32, #tpu.memory_space<vmem>>, vector<1x256xf32>
    %82 = arith.mulf %80, %81 : vector<1x256xf32>
    %c32_i32 = arith.constant 32 : i32
    %83 = tpu.dynamic_rotate %73 by %c32_i32 dim 1 : vector<16x256xf32>, i32 -> vector<16x256xf32>
    %c1_52 = arith.constant 1 : index
    %c0_53 = arith.constant 0 : index
    %c0_54 = arith.constant 0 : index
    %84 = vector.load %arg6[%c1_52, %c0_53, %c0_54] : memref<7x16x1xf32, #tpu.memory_space<vmem>>, vector<1x16x1xf32>
    %85 = vector.shape_cast %84 : vector<1x16x1xf32> to vector<16x1xf32>
    %86 = vector.broadcast %85 : vector<16x1xf32> to vector<16x256xf32>
    %87 = arith.mulf %83, %86 : vector<16x256xf32>
    %cst_55 = arith.constant dense<0.000000e+00> : vector<256xf32>
    %88 = vector.multi_reduction <add>, %87, %cst_55 [0] : vector<16x256xf32> to vector<256xf32>
    %89 = vector.shape_cast %88 : vector<256xf32> to vector<1x256xf32>
    %c8_56 = arith.constant 8 : index
    %c0_57 = arith.constant 0 : index
    %90 = vector.load %arg7[%c8_56, %c0_57] : memref<14x256xf32, #tpu.memory_space<vmem>>, vector<1x256xf32>
    %91 = arith.mulf %89, %90 : vector<1x256xf32>
    %c16_i32 = arith.constant 16 : i32
    %92 = tpu.dynamic_rotate %73 by %c16_i32 dim 1 : vector<16x256xf32>, i32 -> vector<16x256xf32>
    %c2_58 = arith.constant 2 : index
    %c0_59 = arith.constant 0 : index
    %c0_60 = arith.constant 0 : index
    %93 = vector.load %arg6[%c2_58, %c0_59, %c0_60] : memref<7x16x1xf32, #tpu.memory_space<vmem>>, vector<1x16x1xf32>
    %94 = vector.shape_cast %93 : vector<1x16x1xf32> to vector<16x1xf32>
    %95 = vector.broadcast %94 : vector<16x1xf32> to vector<16x256xf32>
    %96 = arith.mulf %92, %95 : vector<16x256xf32>
    %cst_61 = arith.constant dense<0.000000e+00> : vector<256xf32>
    %97 = vector.multi_reduction <add>, %96, %cst_61 [0] : vector<16x256xf32> to vector<256xf32>
    %98 = vector.shape_cast %97 : vector<256xf32> to vector<1x256xf32>
    %c9 = arith.constant 9 : index
    %c0_62 = arith.constant 0 : index
    %99 = vector.load %arg7[%c9, %c0_62] : memref<14x256xf32, #tpu.memory_space<vmem>>, vector<1x256xf32>
    %100 = arith.mulf %98, %99 : vector<1x256xf32>
    %c3 = arith.constant 3 : index
    %c0_63 = arith.constant 0 : index
    %c0_64 = arith.constant 0 : index
    %101 = vector.load %arg6[%c3, %c0_63, %c0_64] : memref<7x16x1xf32, #tpu.memory_space<vmem>>, vector<1x16x1xf32>
    %102 = vector.shape_cast %101 : vector<1x16x1xf32> to vector<16x1xf32>
    %103 = vector.broadcast %102 : vector<16x1xf32> to vector<16x256xf32>
    %104 = arith.mulf %73, %103 : vector<16x256xf32>
    %cst_65 = arith.constant dense<0.000000e+00> : vector<256xf32>
    %105 = vector.multi_reduction <add>, %104, %cst_65 [0] : vector<16x256xf32> to vector<256xf32>
    %106 = vector.shape_cast %105 : vector<256xf32> to vector<1x256xf32>
    %c240_i32 = arith.constant 240 : i32
    %107 = tpu.dynamic_rotate %73 by %c240_i32 dim 1 : vector<16x256xf32>, i32 -> vector<16x256xf32>
    %c4_66 = arith.constant 4 : index
    %c0_67 = arith.constant 0 : index
    %c0_68 = arith.constant 0 : index
    %108 = vector.load %arg6[%c4_66, %c0_67, %c0_68] : memref<7x16x1xf32, #tpu.memory_space<vmem>>, vector<1x16x1xf32>
    %109 = vector.shape_cast %108 : vector<1x16x1xf32> to vector<16x1xf32>
    %110 = vector.broadcast %109 : vector<16x1xf32> to vector<16x256xf32>
    %111 = arith.mulf %107, %110 : vector<16x256xf32>
    %cst_69 = arith.constant dense<0.000000e+00> : vector<256xf32>
    %112 = vector.multi_reduction <add>, %111, %cst_69 [0] : vector<16x256xf32> to vector<256xf32>
    %113 = vector.shape_cast %112 : vector<256xf32> to vector<1x256xf32>
    %c11 = arith.constant 11 : index
    %c0_70 = arith.constant 0 : index
    %114 = vector.load %arg7[%c11, %c0_70] : memref<14x256xf32, #tpu.memory_space<vmem>>, vector<1x256xf32>
    %115 = arith.mulf %113, %114 : vector<1x256xf32>
    %c224_i32 = arith.constant 224 : i32
    %116 = tpu.dynamic_rotate %73 by %c224_i32 dim 1 : vector<16x256xf32>, i32 -> vector<16x256xf32>
    %c5_71 = arith.constant 5 : index
    %c0_72 = arith.constant 0 : index
    %c0_73 = arith.constant 0 : index
    %117 = vector.load %arg6[%c5_71, %c0_72, %c0_73] : memref<7x16x1xf32, #tpu.memory_space<vmem>>, vector<1x16x1xf32>
    %118 = vector.shape_cast %117 : vector<1x16x1xf32> to vector<16x1xf32>
    %119 = vector.broadcast %118 : vector<16x1xf32> to vector<16x256xf32>
    %120 = arith.mulf %116, %119 : vector<16x256xf32>
    %cst_74 = arith.constant dense<0.000000e+00> : vector<256xf32>
    %121 = vector.multi_reduction <add>, %120, %cst_74 [0] : vector<16x256xf32> to vector<256xf32>
    %122 = vector.shape_cast %121 : vector<256xf32> to vector<1x256xf32>
    %c12_75 = arith.constant 12 : index
    %c0_76 = arith.constant 0 : index
    %123 = vector.load %arg7[%c12_75, %c0_76] : memref<14x256xf32, #tpu.memory_space<vmem>>, vector<1x256xf32>
    %124 = arith.mulf %122, %123 : vector<1x256xf32>
    %c208_i32 = arith.constant 208 : i32
    %125 = tpu.dynamic_rotate %73 by %c208_i32 dim 1 : vector<16x256xf32>, i32 -> vector<16x256xf32>
    %c6_77 = arith.constant 6 : index
    %c0_78 = arith.constant 0 : index
    %c0_79 = arith.constant 0 : index
    %126 = vector.load %arg6[%c6_77, %c0_78, %c0_79] : memref<7x16x1xf32, #tpu.memory_space<vmem>>, vector<1x16x1xf32>
    %127 = vector.shape_cast %126 : vector<1x16x1xf32> to vector<16x1xf32>
    %128 = vector.broadcast %127 : vector<16x1xf32> to vector<16x256xf32>
    %129 = arith.mulf %125, %128 : vector<16x256xf32>
    %cst_80 = arith.constant dense<0.000000e+00> : vector<256xf32>
    %130 = vector.multi_reduction <add>, %129, %cst_80 [0] : vector<16x256xf32> to vector<256xf32>
    %131 = vector.shape_cast %130 : vector<256xf32> to vector<1x256xf32>
    %c13 = arith.constant 13 : index
    %c0_81 = arith.constant 0 : index
    %132 = vector.load %arg7[%c13, %c0_81] : memref<14x256xf32, #tpu.memory_space<vmem>>, vector<1x256xf32>
    %133 = arith.mulf %131, %132 : vector<1x256xf32>
    %134 = arith.addf %82, %91 : vector<1x256xf32>
    %135 = arith.addf %100, %106 : vector<1x256xf32>
    %136 = arith.addf %115, %124 : vector<1x256xf32>
    %137 = arith.addf %134, %135 : vector<1x256xf32>
    %138 = arith.addf %136, %133 : vector<1x256xf32>
    %139 = arith.addf %137, %138 : vector<1x256xf32>
    %140 = vector.broadcast %0 : f32 to vector<1x256xf32>
    %141 = arith.addf %139, %140 : vector<1x256xf32>
    %cst_82 = arith.constant 5.000000e-01 : f32
    %142 = vector.broadcast %cst_82 : f32 to vector<1x256xf32>
    %143 = arith.mulf %142, %141 : vector<1x256xf32>
    %144 = math.tanh %143 : vector<1x256xf32>
    %cst_83 = arith.constant 5.000000e-01 : f32
    %145 = vector.broadcast %cst_83 : f32 to vector<1x256xf32>
    %146 = arith.mulf %145, %144 : vector<1x256xf32>
    %cst_84 = arith.constant 5.000000e-01 : f32
    %147 = vector.broadcast %cst_84 : f32 to vector<1x256xf32>
    %148 = arith.addf %146, %147 : vector<1x256xf32>
    %149 = vector.broadcast %148 : vector<1x256xf32> to vector<32x256xf32>
    %150 = arith.mulf %33, %149 : vector<32x256xf32>
    %c0_85 = arith.constant 0 : index
    %c0_86 = arith.constant 0 : index
    %c0_87 = arith.constant 0 : index
    %151 = vector.load %arg9[%c0_85, %c0_86, %c0_87] : memref<2x32x256xf32, #tpu.memory_space<vmem>>, vector<1x32x256xf32>
    %152 = vector.shape_cast %151 : vector<1x32x256xf32> to vector<32x256xf32>
    %153 = vector.shape_cast %150 : vector<32x256xf32> to vector<1x32x256xf32>
    tpu.vector_store %arg9[%c0_85, %c0_86, %c0_87], %153 {strides = array<i32>} : memref<2x32x256xf32, #tpu.memory_space<vmem>>, vector<1x32x256xf32>,
    %c1_88 = arith.constant 1 : index
    %c0_89 = arith.constant 0 : index
    %c0_90 = arith.constant 0 : index
    %154 = vector.load %arg1[%c1_88, %c0_89, %c0_90] : memref<2x32x256xf32, #tpu.memory_space<vmem>>, vector<1x32x256xf32>
    %155 = vector.shape_cast %154 : vector<1x32x256xf32> to vector<32x256xf32>
    %cst_91 = arith.constant dense<0.000000e+00> : vector<32xf32>
    %156 = vector.multi_reduction <add>, %155, %cst_91 [1] : vector<32x256xf32> to vector<32xf32>
    %157 = vector.shape_cast %156 : vector<32xf32> to vector<32x1xf32>
    %cst_92 = arith.constant 2.560000e+02 : f32
    %158 = vector.broadcast %cst_92 : f32 to vector<32x1xf32>
    %159 = arith.divf %157, %158 : vector<32x1xf32>
    %c0_93 = arith.constant 0 : index
    %c0_94 = arith.constant 0 : index
    %160 = vector.load %arg2[%c0_93, %c0_94] : memref<32x2xf32, #tpu.memory_space<vmem>>, vector<32x2xf32>
    %161 = vector.broadcast %159 : vector<32x1xf32> to vector<32x2xf32>
    %162 = arith.mulf %160, %161 : vector<32x2xf32>
    %cst_95 = arith.constant dense<0.000000e+00> : vector<2xf32>
    %163 = vector.multi_reduction <add>, %162, %cst_95 [0] : vector<32x2xf32> to vector<2xf32>
    %164 = vector.shape_cast %163 : vector<2xf32> to vector<1x2xf32>
    %c0_96 = arith.constant 0 : index
    %c0_97 = arith.constant 0 : index
    %165 = vector.load %arg3[%c0_96, %c0_97] : memref<1x2xf32, #tpu.memory_space<vmem>>, vector<1x2xf32>
    %166 = arith.addf %164, %165 : vector<1x2xf32>
    %cst_98 = arith.constant 0.000000e+00 : f32
    %167 = vector.broadcast %cst_98 : f32 to vector<1x2xf32>
    %168 = arith.maximumf %166, %167 : vector<1x2xf32>
    %c0_99 = arith.constant 0 : index
    %c0_100 = arith.constant 0 : index
    %169 = vector.load %arg4[%c0_99, %c0_100] : memref<32x2xf32, #tpu.memory_space<vmem>>, vector<32x2xf32>
    %170 = vector.broadcast %168 : vector<1x2xf32> to vector<32x2xf32>
    %171 = arith.mulf %169, %170 : vector<32x2xf32>
    %cst_101 = arith.constant dense<0.000000e+00> : vector<32xf32>
    %172 = vector.multi_reduction <add>, %171, %cst_101 [1] : vector<32x2xf32> to vector<32xf32>
    %173 = vector.shape_cast %172 : vector<32xf32> to vector<32x1xf32>
    %c0_102 = arith.constant 0 : index
    %c0_103 = arith.constant 0 : index
    %174 = vector.load %arg5[%c0_102, %c0_103] : memref<32x1xf32, #tpu.memory_space<vmem>>, vector<32x1xf32>
    %175 = arith.addf %173, %174 : vector<32x1xf32>
    %cst_104 = arith.constant 5.000000e-01 : f32
    %176 = vector.broadcast %cst_104 : f32 to vector<32x1xf32>
    %177 = arith.mulf %176, %175 : vector<32x1xf32>
    %178 = math.tanh %177 : vector<32x1xf32>
    %cst_105 = arith.constant 5.000000e-01 : f32
    %179 = vector.broadcast %cst_105 : f32 to vector<32x1xf32>
    %180 = arith.mulf %179, %178 : vector<32x1xf32>
    %cst_106 = arith.constant 5.000000e-01 : f32
    %181 = vector.broadcast %cst_106 : f32 to vector<32x1xf32>
    %182 = arith.addf %180, %181 : vector<32x1xf32>
    %183 = vector.broadcast %182 : vector<32x1xf32> to vector<32x256xf32>
    %184 = arith.mulf %155, %183 : vector<32x256xf32>
    %cst_107 = arith.constant dense<0.000000e+00> : vector<256xf32>
    %185 = vector.multi_reduction <add>, %184, %cst_107 [0] : vector<32x256xf32> to vector<256xf32>
    %186 = vector.shape_cast %185 : vector<256xf32> to vector<1x256xf32>
    %cst_108 = arith.constant 3.200000e+01 : f32
    %187 = vector.broadcast %cst_108 : f32 to vector<1x256xf32>
    %188 = arith.divf %186, %187 : vector<1x256xf32>
    %cst_109 = arith.constant dense<0xFF800000> : vector<256xf32>
    %189 = vector.multi_reduction <maximumf>, %184, %cst_109 [0] : vector<32x256xf32> to vector<256xf32>
    %190 = vector.shape_cast %189 : vector<256xf32> to vector<1x256xf32>
    %c6_110 = arith.constant 6 : index
    %c0_111 = arith.constant 0 : index
    %191 = vector.load %arg10[%c6_110, %c0_111] : memref<16x256xf32, #tpu.memory_space<vmem>>, vector<1x256xf32>
    tpu.vector_store %arg10[%c6_110, %c0_111], %188 {strides = array<i32>} : memref<16x256xf32, #tpu.memory_space<vmem>>, vector<1x256xf32>,
    %c7_112 = arith.constant 7 : index
    %c0_113 = arith.constant 0 : index
    %192 = vector.load %arg10[%c7_112, %c0_113] : memref<16x256xf32, #tpu.memory_space<vmem>>, vector<1x256xf32>
    tpu.vector_store %arg10[%c7_112, %c0_113], %190 {strides = array<i32>} : memref<16x256xf32, #tpu.memory_space<vmem>>, vector<1x256xf32>,
    %c6_114 = arith.constant 6 : index
    %c0_115 = arith.constant 0 : index
    %193 = vector.load %arg10[%c6_114, %c0_115] : memref<16x256xf32, #tpu.memory_space<vmem>>, vector<2x256xf32>
    %c3_i32_116 = arith.constant 3 : i32
    %194 = tpu.dynamic_rotate %193 by %c3_i32_116 dim 1 : vector<2x256xf32>, i32 -> vector<2x256xf32>
    %c0_117 = arith.constant 0 : index
    %c0_118 = arith.constant 0 : index
    %195 = vector.load %arg7[%c0_117, %c0_118] : memref<14x256xf32, #tpu.memory_space<vmem>>, vector<1x256xf32>
    %196 = vector.broadcast %195 : vector<1x256xf32> to vector<2x256xf32>
    %197 = arith.mulf %194, %196 : vector<2x256xf32>
    %c0_119 = arith.constant 0 : index
    %c0_120 = arith.constant 0 : index
    %198 = vector.load %arg10[%c0_119, %c0_120] : memref<16x256xf32, #tpu.memory_space<vmem>>, vector<2x256xf32>
    tpu.vector_store %arg10[%c0_119, %c0_120], %197 {strides = array<i32>} : memref<16x256xf32, #tpu.memory_space<vmem>>, vector<2x256xf32>,
    %c2_i32_121 = arith.constant 2 : i32
    %199 = tpu.dynamic_rotate %193 by %c2_i32_121 dim 1 : vector<2x256xf32>, i32 -> vector<2x256xf32>
    %c1_122 = arith.constant 1 : index
    %c0_123 = arith.constant 0 : index
    %200 = vector.load %arg7[%c1_122, %c0_123] : memref<14x256xf32, #tpu.memory_space<vmem>>, vector<1x256xf32>
    %201 = vector.broadcast %200 : vector<1x256xf32> to vector<2x256xf32>
    %202 = arith.mulf %199, %201 : vector<2x256xf32>
    %c2_124 = arith.constant 2 : index
    %c0_125 = arith.constant 0 : index
    %203 = vector.load %arg10[%c2_124, %c0_125] : memref<16x256xf32, #tpu.memory_space<vmem>>, vector<2x256xf32>
    tpu.vector_store %arg10[%c2_124, %c0_125], %202 {strides = array<i32>} : memref<16x256xf32, #tpu.memory_space<vmem>>, vector<2x256xf32>,
    %c1_i32_126 = arith.constant 1 : i32
    %204 = tpu.dynamic_rotate %193 by %c1_i32_126 dim 1 : vector<2x256xf32>, i32 -> vector<2x256xf32>
    %c2_127 = arith.constant 2 : index
    %c0_128 = arith.constant 0 : index
    %205 = vector.load %arg7[%c2_127, %c0_128] : memref<14x256xf32, #tpu.memory_space<vmem>>, vector<1x256xf32>
    %206 = vector.broadcast %205 : vector<1x256xf32> to vector<2x256xf32>
    %207 = arith.mulf %204, %206 : vector<2x256xf32>
    %c4_129 = arith.constant 4 : index
    %c0_130 = arith.constant 0 : index
    %208 = vector.load %arg10[%c4_129, %c0_130] : memref<16x256xf32, #tpu.memory_space<vmem>>, vector<2x256xf32>
    tpu.vector_store %arg10[%c4_129, %c0_130], %207 {strides = array<i32>} : memref<16x256xf32, #tpu.memory_space<vmem>>, vector<2x256xf32>,
    %c255_i32_131 = arith.constant 255 : i32
    %209 = tpu.dynamic_rotate %193 by %c255_i32_131 dim 1 : vector<2x256xf32>, i32 -> vector<2x256xf32>
    %c4_132 = arith.constant 4 : index
    %c0_133 = arith.constant 0 : index
    %210 = vector.load %arg7[%c4_132, %c0_133] : memref<14x256xf32, #tpu.memory_space<vmem>>, vector<1x256xf32>
    %211 = vector.broadcast %210 : vector<1x256xf32> to vector<2x256xf32>
    %212 = arith.mulf %209, %211 : vector<2x256xf32>
    %c8_134 = arith.constant 8 : index
    %c0_135 = arith.constant 0 : index
    %213 = vector.load %arg10[%c8_134, %c0_135] : memref<16x256xf32, #tpu.memory_space<vmem>>, vector<2x256xf32>
    tpu.vector_store %arg10[%c8_134, %c0_135], %212 {strides = array<i32>} : memref<16x256xf32, #tpu.memory_space<vmem>>, vector<2x256xf32>,
    %c254_i32_136 = arith.constant 254 : i32
    %214 = tpu.dynamic_rotate %193 by %c254_i32_136 dim 1 : vector<2x256xf32>, i32 -> vector<2x256xf32>
    %c5_137 = arith.constant 5 : index
    %c0_138 = arith.constant 0 : index
    %215 = vector.load %arg7[%c5_137, %c0_138] : memref<14x256xf32, #tpu.memory_space<vmem>>, vector<1x256xf32>
    %216 = vector.broadcast %215 : vector<1x256xf32> to vector<2x256xf32>
    %217 = arith.mulf %214, %216 : vector<2x256xf32>
    %c10_139 = arith.constant 10 : index
    %c0_140 = arith.constant 0 : index
    %218 = vector.load %arg10[%c10_139, %c0_140] : memref<16x256xf32, #tpu.memory_space<vmem>>, vector<2x256xf32>
    tpu.vector_store %arg10[%c10_139, %c0_140], %217 {strides = array<i32>} : memref<16x256xf32, #tpu.memory_space<vmem>>, vector<2x256xf32>,
    %c253_i32_141 = arith.constant 253 : i32
    %219 = tpu.dynamic_rotate %193 by %c253_i32_141 dim 1 : vector<2x256xf32>, i32 -> vector<2x256xf32>
    %c6_142 = arith.constant 6 : index
    %c0_143 = arith.constant 0 : index
    %220 = vector.load %arg7[%c6_142, %c0_143] : memref<14x256xf32, #tpu.memory_space<vmem>>, vector<1x256xf32>
    %221 = vector.broadcast %220 : vector<1x256xf32> to vector<2x256xf32>
    %222 = arith.mulf %219, %221 : vector<2x256xf32>
    %c12_144 = arith.constant 12 : index
    %c0_145 = arith.constant 0 : index
    %223 = vector.load %arg10[%c12_144, %c0_145] : memref<16x256xf32, #tpu.memory_space<vmem>>, vector<2x256xf32>
    tpu.vector_store %arg10[%c12_144, %c0_145], %222 {strides = array<i32>} : memref<16x256xf32, #tpu.memory_space<vmem>>, vector<2x256xf32>,
    %c0_146 = arith.constant 0 : index
    %c0_147 = arith.constant 0 : index
    %224 = vector.load %arg10[%c0_146, %c0_147] : memref<16x256xf32, #tpu.memory_space<vmem>>, vector<16x256xf32>
    %c48_i32_148 = arith.constant 48 : i32
    %225 = tpu.dynamic_rotate %224 by %c48_i32_148 dim 1 : vector<16x256xf32>, i32 -> vector<16x256xf32>
    %c0_149 = arith.constant 0 : index
    %c0_150 = arith.constant 0 : index
    %c0_151 = arith.constant 0 : index
    %226 = vector.load %arg6[%c0_149, %c0_150, %c0_151] : memref<7x16x1xf32, #tpu.memory_space<vmem>>, vector<1x16x1xf32>
    %227 = vector.shape_cast %226 : vector<1x16x1xf32> to vector<16x1xf32>
    %228 = vector.broadcast %227 : vector<16x1xf32> to vector<16x256xf32>
    %229 = arith.mulf %225, %228 : vector<16x256xf32>
    %cst_152 = arith.constant dense<0.000000e+00> : vector<256xf32>
    %230 = vector.multi_reduction <add>, %229, %cst_152 [0] : vector<16x256xf32> to vector<256xf32>
    %231 = vector.shape_cast %230 : vector<256xf32> to vector<1x256xf32>
    %c7_153 = arith.constant 7 : index
    %c0_154 = arith.constant 0 : index
    %232 = vector.load %arg7[%c7_153, %c0_154] : memref<14x256xf32, #tpu.memory_space<vmem>>, vector<1x256xf32>
    %233 = arith.mulf %231, %232 : vector<1x256xf32>
    %c32_i32_155 = arith.constant 32 : i32
    %234 = tpu.dynamic_rotate %224 by %c32_i32_155 dim 1 : vector<16x256xf32>, i32 -> vector<16x256xf32>
    %c1_156 = arith.constant 1 : index
    %c0_157 = arith.constant 0 : index
    %c0_158 = arith.constant 0 : index
    %235 = vector.load %arg6[%c1_156, %c0_157, %c0_158] : memref<7x16x1xf32, #tpu.memory_space<vmem>>, vector<1x16x1xf32>
    %236 = vector.shape_cast %235 : vector<1x16x1xf32> to vector<16x1xf32>
    %237 = vector.broadcast %236 : vector<16x1xf32> to vector<16x256xf32>
    %238 = arith.mulf %234, %237 : vector<16x256xf32>
    %cst_159 = arith.constant dense<0.000000e+00> : vector<256xf32>
    %239 = vector.multi_reduction <add>, %238, %cst_159 [0] : vector<16x256xf32> to vector<256xf32>
    %240 = vector.shape_cast %239 : vector<256xf32> to vector<1x256xf32>
    %c8_160 = arith.constant 8 : index
    %c0_161 = arith.constant 0 : index
    %241 = vector.load %arg7[%c8_160, %c0_161] : memref<14x256xf32, #tpu.memory_space<vmem>>, vector<1x256xf32>
    %242 = arith.mulf %240, %241 : vector<1x256xf32>
    %c16_i32_162 = arith.constant 16 : i32
    %243 = tpu.dynamic_rotate %224 by %c16_i32_162 dim 1 : vector<16x256xf32>, i32 -> vector<16x256xf32>
    %c2_163 = arith.constant 2 : index
    %c0_164 = arith.constant 0 : index
    %c0_165 = arith.constant 0 : index
    %244 = vector.load %arg6[%c2_163, %c0_164, %c0_165] : memref<7x16x1xf32, #tpu.memory_space<vmem>>, vector<1x16x1xf32>
    %245 = vector.shape_cast %244 : vector<1x16x1xf32> to vector<16x1xf32>
    %246 = vector.broadcast %245 : vector<16x1xf32> to vector<16x256xf32>
    %247 = arith.mulf %243, %246 : vector<16x256xf32>
    %cst_166 = arith.constant dense<0.000000e+00> : vector<256xf32>
    %248 = vector.multi_reduction <add>, %247, %cst_166 [0] : vector<16x256xf32> to vector<256xf32>
    %249 = vector.shape_cast %248 : vector<256xf32> to vector<1x256xf32>
    %c9_167 = arith.constant 9 : index
    %c0_168 = arith.constant 0 : index
    %250 = vector.load %arg7[%c9_167, %c0_168] : memref<14x256xf32, #tpu.memory_space<vmem>>, vector<1x256xf32>
    %251 = arith.mulf %249, %250 : vector<1x256xf32>
    %c3_169 = arith.constant 3 : index
    %c0_170 = arith.constant 0 : index
    %c0_171 = arith.constant 0 : index
    %252 = vector.load %arg6[%c3_169, %c0_170, %c0_171] : memref<7x16x1xf32, #tpu.memory_space<vmem>>, vector<1x16x1xf32>
    %253 = vector.shape_cast %252 : vector<1x16x1xf32> to vector<16x1xf32>
    %254 = vector.broadcast %253 : vector<16x1xf32> to vector<16x256xf32>
    %255 = arith.mulf %224, %254 : vector<16x256xf32>
    %cst_172 = arith.constant dense<0.000000e+00> : vector<256xf32>
    %256 = vector.multi_reduction <add>, %255, %cst_172 [0] : vector<16x256xf32> to vector<256xf32>
    %257 = vector.shape_cast %256 : vector<256xf32> to vector<1x256xf32>
    %c240_i32_173 = arith.constant 240 : i32
    %258 = tpu.dynamic_rotate %224 by %c240_i32_173 dim 1 : vector<16x256xf32>, i32 -> vector<16x256xf32>
    %c4_174 = arith.constant 4 : index
    %c0_175 = arith.constant 0 : index
    %c0_176 = arith.constant 0 : index
    %259 = vector.load %arg6[%c4_174, %c0_175, %c0_176] : memref<7x16x1xf32, #tpu.memory_space<vmem>>, vector<1x16x1xf32>
    %260 = vector.shape_cast %259 : vector<1x16x1xf32> to vector<16x1xf32>
    %261 = vector.broadcast %260 : vector<16x1xf32> to vector<16x256xf32>
    %262 = arith.mulf %258, %261 : vector<16x256xf32>
    %cst_177 = arith.constant dense<0.000000e+00> : vector<256xf32>
    %263 = vector.multi_reduction <add>, %262, %cst_177 [0] : vector<16x256xf32> to vector<256xf32>
    %264 = vector.shape_cast %263 : vector<256xf32> to vector<1x256xf32>
    %c11_178 = arith.constant 11 : index
    %c0_179 = arith.constant 0 : index
    %265 = vector.load %arg7[%c11_178, %c0_179] : memref<14x256xf32, #tpu.memory_space<vmem>>, vector<1x256xf32>
    %266 = arith.mulf %264, %265 : vector<1x256xf32>
    %c224_i32_180 = arith.constant 224 : i32
    %267 = tpu.dynamic_rotate %224 by %c224_i32_180 dim 1 : vector<16x256xf32>, i32 -> vector<16x256xf32>
    %c5_181 = arith.constant 5 : index
    %c0_182 = arith.constant 0 : index
    %c0_183 = arith.constant 0 : index
    %268 = vector.load %arg6[%c5_181, %c0_182, %c0_183] : memref<7x16x1xf32, #tpu.memory_space<vmem>>, vector<1x16x1xf32>
    %269 = vector.shape_cast %268 : vector<1x16x1xf32> to vector<16x1xf32>
    %270 = vector.broadcast %269 : vector<16x1xf32> to vector<16x256xf32>
    %271 = arith.mulf %267, %270 : vector<16x256xf32>
    %cst_184 = arith.constant dense<0.000000e+00> : vector<256xf32>
    %272 = vector.multi_reduction <add>, %271, %cst_184 [0] : vector<16x256xf32> to vector<256xf32>
    %273 = vector.shape_cast %272 : vector<256xf32> to vector<1x256xf32>
    %c12_185 = arith.constant 12 : index
    %c0_186 = arith.constant 0 : index
    %274 = vector.load %arg7[%c12_185, %c0_186] : memref<14x256xf32, #tpu.memory_space<vmem>>, vector<1x256xf32>
    %275 = arith.mulf %273, %274 : vector<1x256xf32>
    %c208_i32_187 = arith.constant 208 : i32
    %276 = tpu.dynamic_rotate %224 by %c208_i32_187 dim 1 : vector<16x256xf32>, i32 -> vector<16x256xf32>
    %c6_188 = arith.constant 6 : index
    %c0_189 = arith.constant 0 : index
    %c0_190 = arith.constant 0 : index
    %277 = vector.load %arg6[%c6_188, %c0_189, %c0_190] : memref<7x16x1xf32, #tpu.memory_space<vmem>>, vector<1x16x1xf32>
    %278 = vector.shape_cast %277 : vector<1x16x1xf32> to vector<16x1xf32>
    %279 = vector.broadcast %278 : vector<16x1xf32> to vector<16x256xf32>
    %280 = arith.mulf %276, %279 : vector<16x256xf32>
    %cst_191 = arith.constant dense<0.000000e+00> : vector<256xf32>
    %281 = vector.multi_reduction <add>, %280, %cst_191 [0] : vector<16x256xf32> to vector<256xf32>
    %282 = vector.shape_cast %281 : vector<256xf32> to vector<1x256xf32>
    %c13_192 = arith.constant 13 : index
    %c0_193 = arith.constant 0 : index
    %283 = vector.load %arg7[%c13_192, %c0_193] : memref<14x256xf32, #tpu.memory_space<vmem>>, vector<1x256xf32>
    %284 = arith.mulf %282, %283 : vector<1x256xf32>
    %285 = arith.addf %233, %242 : vector<1x256xf32>
    %286 = arith.addf %251, %257 : vector<1x256xf32>
    %287 = arith.addf %266, %275 : vector<1x256xf32>
    %288 = arith.addf %285, %286 : vector<1x256xf32>
    %289 = arith.addf %287, %284 : vector<1x256xf32>
    %290 = arith.addf %288, %289 : vector<1x256xf32>
    %291 = vector.broadcast %0 : f32 to vector<1x256xf32>
    %292 = arith.addf %290, %291 : vector<1x256xf32>
    %cst_194 = arith.constant 5.000000e-01 : f32
    %293 = vector.broadcast %cst_194 : f32 to vector<1x256xf32>
    %294 = arith.mulf %293, %292 : vector<1x256xf32>
    %295 = math.tanh %294 : vector<1x256xf32>
    %cst_195 = arith.constant 5.000000e-01 : f32
    %296 = vector.broadcast %cst_195 : f32 to vector<1x256xf32>
    %297 = arith.mulf %296, %295 : vector<1x256xf32>
    %cst_196 = arith.constant 5.000000e-01 : f32
    %298 = vector.broadcast %cst_196 : f32 to vector<1x256xf32>
    %299 = arith.addf %297, %298 : vector<1x256xf32>
    %300 = vector.broadcast %299 : vector<1x256xf32> to vector<32x256xf32>
    %301 = arith.mulf %184, %300 : vector<32x256xf32>
    %c1_197 = arith.constant 1 : index
    %c0_198 = arith.constant 0 : index
    %c0_199 = arith.constant 0 : index
    %302 = vector.load %arg9[%c1_197, %c0_198, %c0_199] : memref<2x32x256xf32, #tpu.memory_space<vmem>>, vector<1x32x256xf32>
    %303 = vector.shape_cast %302 : vector<1x32x256xf32> to vector<32x256xf32>
    %304 = vector.shape_cast %301 : vector<32x256xf32> to vector<1x32x256xf32>
    tpu.vector_store %arg9[%c1_197, %c0_198, %c0_199], %304 {strides = array<i32>} : memref<2x32x256xf32, #tpu.memory_space<vmem>>, vector<1x32x256xf32>,
    return
  }
  func.func @transform_0(%arg0: i32) -> (i32, i32, i32) {
    %c0_i32 = arith.constant 0 : i32
    %c0_i32_0 = arith.constant 0 : i32
    %c0_i32_1 = arith.constant 0 : i32
    return %arg0, %c0_i32, %c0_i32_0 : i32, i32, i32
  }
  func.func @transform_1(%arg0: i32) -> (i32, i32) {
    %c0_i32 = arith.constant 0 : i32
    %c0_i32_0 = arith.constant 0 : i32
    %c0_i32_1 = arith.constant 0 : i32
    return %c0_i32, %c0_i32_0 : i32, i32
  }
  func.func @transform_2(%arg0: i32) -> (i32, i32) {
    %c0_i32 = arith.constant 0 : i32
    %c0_i32_0 = arith.constant 0 : i32
    %c0_i32_1 = arith.constant 0 : i32
    return %c0_i32, %c0_i32_0 : i32, i32
  }
  func.func @transform_3(%arg0: i32) -> (i32, i32) {
    %c0_i32 = arith.constant 0 : i32
    %c0_i32_0 = arith.constant 0 : i32
    %c0_i32_1 = arith.constant 0 : i32
    return %c0_i32, %c0_i32_0 : i32, i32
  }
  func.func @transform_4(%arg0: i32) -> (i32, i32) {
    %c0_i32 = arith.constant 0 : i32
    %c0_i32_0 = arith.constant 0 : i32
    %c0_i32_1 = arith.constant 0 : i32
    return %c0_i32, %c0_i32_0 : i32, i32
  }
  func.func @transform_5(%arg0: i32) -> (i32, i32, i32) {
    %c0_i32 = arith.constant 0 : i32
    %c0_i32_0 = arith.constant 0 : i32
    %c0_i32_1 = arith.constant 0 : i32
    %c0_i32_2 = arith.constant 0 : i32
    return %c0_i32, %c0_i32_0, %c0_i32_1 : i32, i32, i32
  }
  func.func @transform_6(%arg0: i32) -> (i32, i32) {
    %c0_i32 = arith.constant 0 : i32
    %c0_i32_0 = arith.constant 0 : i32
    %c0_i32_1 = arith.constant 0 : i32
    return %c0_i32, %c0_i32_0 : i32, i32
  }
  func.func @transform_7(%arg0: i32) -> i32 {
    %c0_i32 = arith.constant 0 : i32
    %c0_i32_0 = arith.constant 0 : i32
    return %c0_i32 : i32
  }
  func.func @transform_8(%arg0: i32) -> (i32, i32, i32) {
    %c0_i32 = arith.constant 0 : i32
    %c0_i32_0 = arith.constant 0 : i32
    %c0_i32_1 = arith.constant 0 : i32
    return %arg0, %c0_i32, %c0_i32_0 : i32, i32, i32
  }
}

</mosaic_0001>

<bundles_post_ra>
// kernel: tpu_custom_call.1
= control target key start
LH: loop header
LB: loop body
LE: loop exit
PB: predicated region body
PF: predicated region fallthrough
CT: control target
= control target key end

     0   :  { %s2903_s0 = inlined_call_operand.vmem [shape: f32[2,32,256], index: 0, kind: input, shape index: {}]   ;;  %s2904_s1 = inlined_call_operand.vmem [shape: f32[32,2], index: 1, kind: input, shape index: {}]   ;;  %s2905_s2 = inlined_call_operand.vmem [shape: f32[1,2], index: 2, kind: input, shape index: {}]   ;;  %s2906_s3 = inlined_call_operand.vmem [shape: f32[32,2], index: 3, kind: input, shape index: {}]   ;;  %s2907_s4 = inlined_call_operand.vmem [shape: f32[32,1], index: 4, kind: input, shape index: {}]   ;;  %s2908_s5 = inlined_call_operand.vmem [shape: f32[7,16,1], index: 5, kind: input, shape index: {}]   ;;  %s2909_s6 = inlined_call_operand.vmem [shape: f32[14,256], index: 6, kind: input, shape index: {}]   ;;  %s2910_s7 = inlined_call_operand.<no memory space> [shape: f32[1], index: 7, kind: input, shape index: {}]   ;;  %s2911_s8 = inlined_call_operand.hbm [shape: f32[2,32,256], index: 8, kind: output, shape index: {}]  }
   0x1   :  { %v1843_v0 = vld [vmem:[%s2903_s0] sm:$0xff]  ;;  %v1848_v1 = vld [vmem:[%s2903_s0 + $0x8] sm:$0xff]  ;;  %v1865_v5 = vld [vmem:[%s2903_s0 + $0x10] sm:$0xff] }
   0x2   :  { %v1853_v2 = vld [vmem:[%s2903_s0 + $0x20] sm:$0xff]  ;;  %v42_v3 = vadd.f32 %v1848_v1, %v1843_v0  ;;  %v1860_v4 = vld [vmem:[%s2903_s0 + $0x28] sm:$0xff]  ;;  %v1870_v6 = vld [vmem:[%s2903_s0 + $0x18] sm:$0xff] }
   0x3   :  { %v48_v7 = vadd.f32 %v1860_v4, %v1853_v2  ;;  %v1877_v8 = vld [vmem:[%s2903_s0 + $0x30] sm:$0xff]  ;;  %v1882_v9 = vld [vmem:[%s2903_s0 + $0x38] sm:$0xff]  ;;  %v45_v10 = vadd.f32 %v1870_v6, %v1865_v5  ;;  %v1891_v12 = vld [vmem:[%s2903_s0 + $0x40] sm:$0xff] }
   0x4   :  { %43 = vadd.xlane.f32.xlu0 %v42_v3  ;;  %v51_v11 = vadd.f32 %v1882_v9, %v1877_v8  ;;  %v1896_v13 = vld [vmem:[%s2903_s0 + $0x48] sm:$0xff]  ;;  %v1901_v14 = vld [vmem:[%s2903_s0 + $0x50] sm:$0xff]  ;;  %v1906_v15 = vld [vmem:[%s2903_s0 + $0x58] sm:$0xff] }
   0x5   :  { %49 = vadd.xlane.f32.xlu1 %v48_v7 }
   0x6   :  { %14 = vsyncpa [#allocation5], 0  ;;  %v866_v16 = vadd.f32 %v1896_v13, %v1891_v12  ;;  %v869_v17 = vadd.f32 %v1906_v15, %v1901_v14  ;;  %v1915_v18 = vld [vmem:[%s2903_s0 + $0x60] sm:$0xff]  ;;  %v1920_v19 = vld [vmem:[%s2903_s0 + $0x68] sm:$0xff]  ;;  %vm67_vm0 = vcmask 15360   ;;  %s1782_s17 = smov 127  }
   0x7   :  { %v1925_v20 = vld [vmem:[%s2903_s0 + $0x70] sm:$0xff]  ;;  %v1930_v21 = vld [vmem:[%s2903_s0 + $0x78] sm:$0xff]  ;;  %v872_v22 = vadd.f32 %v1920_v19, %v1915_v18  ;;  %v59_v27 = vld [vmem:[%s2904_s1] sm:$0xff]  ;;  %s1781_s0 = smov 3   ;;  %s1783_s18 = smov 126  }
   0x8   :  { %46 = vadd.xlane.f32.xlu0 %v45_v10  ;;  %v875_v23 = vadd.f32 %v1930_v21, %v1925_v20  ;;  %v61_v29 = vld [vmem:[%s2904_s1 + $0x10] sm:$0xff]  ;;  %v60_v30 = vld [vmem:[%s2904_s1 + $0x8] sm:$0xff]  ;;  %v62_v34 = vld [vmem:[%s2904_s1 + $0x18] sm:$0xff]  ;;  %s1784_s19 = smov 2   ;;  %s1785_s20 = smov 125  }
   0x9   :  { %52 = vadd.xlane.f32.xlu1 %v51_v11  ;;  %s1787_s10 = smov 48   ;;  %s1790_s11 = smov 112  }
   0xa   :  { %s1791_s12 = smov 96   ;;  %s1792_s13 = smov 80  }
   0xc   :  { %867 = vadd.xlane.f32.xlu0 %v866_v16 }
   0xd   :  { %870 = vadd.xlane.f32.xlu1 %v869_v17  ;;  %v88_v17 = vlaneseq }
   0xf   :  { %vm2126_vm1 = vcmp.lt.s32.totalorder %v88_v17, 256 }
  0x10   :  { %873 = vadd.xlane.f32.xlu0 %v872_v22 }
  0x11   :  { %876 = vadd.xlane.f32.xlu1 %v875_v23 }
  0x91   :  { %v44_v24 = vpop.xlane.xlu0 %43 }
  0x92   :  { %v55_v25 = vmul.f32 0.00390625, %v44_v24  ;;  %v50_v26 = vpop.xlane.xlu1 %49 }
  0x93   :  { %v57_v28 = vmul.f32 0.00390625, %v50_v26  ;;  %v1957_v26 = vshrl.u32 %v88_v17, 7 }
  0x94   :  { %v63_v32 = vmul.f32 %v59_v27, %v55_v25 }
  0x95   :  { %v47_v31 = vpop.xlane.xlu0 %46  ;;  %v65_v37 = vmul.f32 %v61_v29, %v57_v28 }
  0x96   :  { %v56_v33 = vmul.f32 0.00390625, %v47_v31  ;;  %v53_v35 = vpop.xlane.xlu1 %52  ;;  %v68_v41 = vsel %vm67_vm0, %v63_v32, 0.0  ;;  %v1963_v32 = vsub.s32 0, %v1957_v26 }
  0x97   :  { %v58_v36 = vmul.f32 0.00390625, %v53_v35  ;;  %v71_v47 = vsel %vm67_vm0, %v65_v37, 0.0  ;;  %v85_v35 = vld [vmem:[%s2906_s3 + $0x8] sm:$0xff] }
  0x98   :  { %v64_v38 = vmul.f32 %v60_v30, %v56_v33 }
  0x99   :  { %v66_v39 = vmul.f32 %v62_v34, %v58_v36  ;;  %v868_v40 = vpop.xlane.xlu0 %867  ;;  %v84_v36 = vld [vmem:[%s2906_s3] sm:$0xff] }
  0x9a   :  { %v69_v42 = vsel %vm67_vm0, %v64_v38, 0.0  ;;  %v878_v43 = vmul.f32 0.00390625, %v868_v40  ;;  %v871_v44 = vpop.xlane.xlu1 %870  ;;  %v87_v40 = vld [vmem:[%s2906_s3 + $0x18] sm:$0xff] }
  0x9b   :  { %v70_v45 = vadd.f32 %v69_v42, %v68_v41  ;;  %v879_v46 = vmul.f32 0.00390625, %v871_v44  ;;  %v73_v48 = vsel %vm67_vm0, %v66_v39, 0.0  ;;  %v903_v39 = vld [vmem:[%s2905_s2] sm:$0x1]  ;;  %v86_v41 = vld [vmem:[%s2906_s3 + $0x10] sm:$0xff]  ;;  %s1789_s3 = smov 16  }
  0x9c   :  { %v886_v49 = vmul.f32 %v878_v43, %v59_v27  ;;  %v81_v27 = vld [vmem:[%s2905_s2] sm:$0x1]  ;;  %s1788_s2 = smov 32  }
  0x9d   :  { %v72_v50 = vadd.f32 %v71_v47, %v70_v45  ;;  %v887_v51 = vmul.f32 %v879_v46, %v60_v30  ;;  %v874_v52 = vpop.xlane.xlu0 %873 }
  0x9e   :  { %v890_v53 = vsel %vm67_vm0, %v886_v49, 0.0  ;;  %v880_v54 = vmul.f32 0.00390625, %v874_v52  ;;  %v877_v55 = vpop.xlane.xlu1 %876 }
  0x9f   :  { %v74_v56 = vadd.f32 %v73_v48, %v72_v50  ;;  %v891_v57 = vsel %vm67_vm0, %v887_v51, 0.0  ;;  %v881_v58 = vmul.f32 0.00390625, %v877_v55 }
  0xa0   :  { %v892_v59 = vadd.f32 %v891_v57, %v890_v53  ;;  %v888_v60 = vmul.f32 %v880_v54, %v61_v29 }
  0xa1   :  { %v75_v61 = vrot.slane %v74_v56, 4  ;;  %v889_v62 = vmul.f32 %v881_v58, %v62_v34 }
  0xa2   :  { %v893_v63 = vsel %vm67_vm0, %v888_v60, 0.0 }
  0xa3   :  { %v76_v3 = vadd.f32 %v75_v61, %v74_v56  ;;  %v894_v7 = vadd.f32 %v893_v63, %v892_v59  ;;  %v895_v10 = vsel %vm67_vm0, %v889_v62, 0.0  ;;  %v1778_v61 = vmov 0   ;;  %v109_v62 = vld [vmem:[%s2907_s4 + $0x8] sm:$0xff]  ;;  %v108_v63 = vld [vmem:[%s2907_s4] sm:$0xff] }
  0xa4   :  { %1729 = vset.pattern.permute.xlu1 %v1778_v61  ;;  %1728 = vset.pattern.permute.xlu0 %v1778_v61 }
  0xa5   :  { %v77_v11 = vrot.slane %v76_v3, 2  ;;  %v896_v16 = vadd.f32 %v895_v10, %v894_v7 }
  0xa7   :  { %v78_v22 = vadd.f32 %v77_v11, %v76_v3  ;;  %v897_v23 = vrot.slane %v896_v16, 4 }
  0xa9   :  { %v79_v24 = vrot.slane %v78_v22, 1  ;;  %v898_v25 = vadd.f32 %v897_v23, %v896_v16  ;;  %v111_v16 = vld [vmem:[%s2907_s4 + $0x18] sm:$0xff] }
  0xab   :  { %v80_v28 = vadd.f32 %v79_v24, %v78_v22  ;;  %v899_v29 = vrot.slane %v898_v25, 2  ;;  %v110_v22 = vld [vmem:[%s2907_s4 + $0x10] sm:$0xff] }
  0xad   :  { %v900_v30 = vadd.f32 %v899_v29, %v898_v25  ;;  %v82_v31 = vadd.f32 %v81_v27, %v80_v28 }
  0xaf   :  { %v901_v33 = vrot.slane %v900_v30, 1  ;;  %v83_v34 = vmax.f32 %v82_v31, 0.0 }
  0xb1   :  { %v902_v37 = vadd.f32 %v901_v33, %v900_v30  ;;  %v91_v38 = vrot.slane %v83_v34, %v1963_v32 }
  0xb3   :  { %v93_v42 = vmul.f32 %v91_v38, %v85_v35  ;;  %v92_v43 = vmul.f32 %v91_v38, %v84_v36  ;;  %v904_v44 = vadd.f32 %v903_v39, %v902_v37  ;;  %v95_v47 = vmul.f32 %v91_v38, %v87_v40 }
  0xb4   :  { %v94_v48 = vmul.f32 %v91_v38, %v86_v41 }
  0xb5   :  { %v99_v45 = vsel %vm67_vm0, %v93_v42, 0.0  ;;  %v96_v46 = vsel %vm67_vm0, %v92_v43, 0.0  ;;  %v905_v49 = vmax.f32 %v904_v44, 0.0  ;;  %v105_v51 = vsel %vm67_vm0, %v95_v47, 0.0 }
  0xb6   :  { %100 = vadd.xlane.f32.xlu1 %v99_v45  ;;  %97 = vadd.xlane.f32.xlu0 %v96_v46  ;;  %v102_v52 = vsel %vm67_vm0, %v94_v48, 0.0  ;;  %v440_v45 = vld [vmem:[%s2908_s5 + $0x8] sm:$0xff] }
  0xb7   :  { %v913_v50 = vrot.slane %v905_v49, %v1963_v32 }
  0xb9   :  { %v915_v53 = vmul.f32 %v913_v50, %v85_v35  ;;  %v914_v54 = vmul.f32 %v913_v50, %v84_v36  ;;  %v917_v55 = vmul.f32 %v913_v50, %v87_v40  ;;  %v916_v56 = vmul.f32 %v913_v50, %v86_v41  ;;  %v2008_v50 = vld [vmem:[%s2908_s5 + $0x18] sm:$0xff] }
  0xba   :  { %106 = vadd.xlane.f32.xlu1 %v105_v51  ;;  %103 = vadd.xlane.f32.xlu0 %v102_v52 }
  0xbb   :  { %v921_v57 = vsel %vm67_vm0, %v915_v53, 0.0  ;;  %v918_v58 = vsel %vm67_vm0, %v914_v54, 0.0  ;;  %v927_v59 = vsel %vm67_vm0, %v917_v55, 0.0  ;;  %v924_v60 = vsel %vm67_vm0, %v916_v56, 0.0  ;;  %v2014_v54 = vld [vmem:[%s2908_s5 + $0x28] sm:$0xff]  ;;  %v439_v55 = vld [vmem:[%s2908_s5] sm:$0xff] }
  0xbe   :  { %922 = vadd.xlane.f32.xlu1 %v921_v57  ;;  %919 = vadd.xlane.f32.xlu0 %v918_v58  ;;  %v2023_v58 = vld [vmem:[%s2908_s5 + $0x38] sm:$0xff] }
  0xc2   :  { %928 = vadd.xlane.f32.xlu1 %v927_v59  ;;  %925 = vadd.xlane.f32.xlu0 %v924_v60  ;;  %v2028_v59 = vld [vmem:[%s2908_s5 + $0x10] sm:$0xff] }
 0x143   :  { %v101_v3 = vpop.xlane.xlu1 %100  ;;  %v98_v7 = vpop.xlane.xlu0 %97 }
 0x144   :  { %v113_v10 = vadd.f32 %v109_v62, %v101_v3  ;;  %v112_v11 = vadd.f32 %v108_v63, %v98_v7  ;;  %v2040_v3 = vld [vmem:[%s2908_s5 + $0x20] sm:$0xff] }
 0x146   :  { %v117_v23 = vmul.f32 0.5, %v113_v10  ;;  %v116_v24 = vmul.f32 0.5, %v112_v11 }
 0x147   :  { %v107_v25 = vpop.xlane.xlu1 %106  ;;  %v104_v27 = vpop.xlane.xlu0 %103 }
 0x148   :  { %1730 = vtanh.f32 %v117_v23  ;;  %v115_v28 = vadd.f32 %v111_v16, %v107_v25  ;;  %v114_v29 = vadd.f32 %v110_v22, %v104_v27  ;;  %v2059_v25 = vld [vmem:[%s2908_s5 + $0x40] sm:$0xff] }
 0x149   :  { %1732 = vtanh.f32 %v116_v24 }
 0x14a   :  { %v119_v30 = vmul.f32 0.5, %v115_v28  ;;  %v118_v31 = vmul.f32 0.5, %v114_v29  ;;  %v2065_v29 = vld [vmem:[%s2908_s5 + $0x50] sm:$0xff] }
 0x14b   :  { %v923_v34 = vpop.xlane.xlu1 %922  ;;  %v920_v52 = vpop.xlane.xlu0 %919 }
 0x14c   :  { %1734 = vtanh.f32 %v119_v30  ;;  %v935_v42 = vadd.f32 %v923_v34, %v109_v62  ;;  %v934_v56 = vadd.f32 %v920_v52, %v108_v63  ;;  %v2035_v63 = vld [vmem:[%s2908_s5 + $0x48] sm:$0xff]  ;;  %v2076_v34 = vld [vmem:[%s2908_s5 + $0x60] sm:$0xff] }
 0x14d   :  { %1736 = vtanh.f32 %v118_v31 }
 0x14e   :  { %v939_v48 = vmul.f32 0.5, %v935_v42  ;;  %v938_v60 = vmul.f32 0.5, %v934_v56 }
 0x14f   :  { %v929_v44 = vpop.xlane.xlu1 %928  ;;  %v926_v57 = vpop.xlane.xlu0 %925 }
 0x150   :  { %v937_v49 = vadd.f32 %v929_v44, %v111_v16  ;;  %1738 = vtanh.f32 %v939_v48  ;;  %v936_v61 = vadd.f32 %v926_v57, %v110_v22  ;;  %v2047_v16 = vld [vmem:[%s2908_s5 + $0x58] sm:$0xff]  ;;  %v2052_v22 = vld [vmem:[%s2908_s5 + $0x30] sm:$0xff] }
 0x152   :  { %v1731_v33 = vpop.eup %1730  ;;  %v941_v53 = vmul.f32 0.5, %v937_v49  ;;  %v940_v7 = vmul.f32 0.5, %v936_v61 }
 0x153   :  { %v1733_v35 = vpop.eup %1732  ;;  %v125_v36 = vmul.f32 0.5, %v1731_v33  ;;  %v2071_v33 = vld [vmem:[%s2908_s5 + $0x68] sm:$0xff]  ;;  %s1780_s5 = smov 1  }
 0x154   :  { %v124_v37 = vmul.f32 0.5, %v1733_v35  ;;  %1740 = vtanh.f32 %v941_v53 }
 0x155   :  { %v129_v38 = vadd.f32 0.5, %v125_v36  ;;  %1742 = vtanh.f32 %v938_v60 }
 0x156   :  { %v1735_v39 = vpop.eup %1734  ;;  %v128_v40 = vadd.f32 0.5, %v124_v37  ;;  %1744 = vtanh.f32 %v940_v7 }
 0x157   :  { %v1737_v41 = vpop.eup %1736  ;;  %139 = vperm.xlu1 %1729, %v129_v38   ;;  %v127_v47 = vmul.f32 0.5, %v1735_v39 }
 0x158   :  { %134 = vperm.xlu0 %1728, %v128_v40   ;;  %v126_v43 = vmul.f32 0.5, %v1737_v41 }
 0x159   :  { %v131_v51 = vadd.f32 0.5, %v127_v47 }
 0x15a   :  { %v130_v46 = vadd.f32 0.5, %v126_v43  ;;  %v1739_v62 = vpop.eup %1738 }
 0x15b   :  { %v947_v10 = vmul.f32 0.5, %v1739_v62 }
 0x15c   :  { %448 = vperm.xlu0 %1728, %v440_v45   ;;  %144 = vperm.xlu1 %1729, %v130_v46  }
 0x15d   :  { %v951_v23 = vadd.f32 0.5, %v947_v10  ;;  %v1779_v10 = vmov 1966171168  }
 0x15e   :  { %v1741_v11 = vpop.eup %1740 }
 0x15f   :  { %v949_v24 = vmul.f32 0.5, %v1741_v11  ;;  %v1743_v28 = vpop.eup %1742  ;;  %v203_v11 = vunpack.c.l.s4 %v1779_v10 }
 0x160   :  { %507 = vperm.xlu0 %1728, %v2008_v50   ;;  %149 = vperm.xlu1 %1729, %v131_v51   ;;  %v946_v30 = vmul.f32 0.5, %v1743_v28  ;;  %v1745_v31 = vpop.eup %1744 }
 0x161   :  { %v953_v27 = vadd.f32 0.5, %v949_v24  ;;  %v948_v36 = vmul.f32 0.5, %v1745_v31 }
 0x162   :  { %v950_v35 = vadd.f32 0.5, %v946_v30 }
 0x163   :  { %v952_v37 = vadd.f32 0.5, %v948_v36 }
 0x164   :  { %566 = vperm.xlu0 %1728, %v2014_v54   ;;  %443 = vperm.xlu1 %1729, %v439_v55  }
 0x168   :  { %612 = vperm.xlu0 %1728, %v2023_v58   ;;  %502 = vperm.xlu1 %1729, %v2028_v59  }
 0x16c   :  { %656 = vperm.xlu0 %1728, %v2035_v63   ;;  %561 = vperm.xlu1 %1729, %v2040_v3  }
 0x170   :  { %715 = vperm.xlu0 %1728, %v2047_v16   ;;  %607 = vperm.xlu1 %1729, %v2052_v22  }
 0x174   :  { %961 = vperm.xlu0 %1728, %v951_v23   ;;  %651 = vperm.xlu1 %1729, %v2059_v25  }
 0x178   :  { %971 = vperm.xlu0 %1728, %v953_v27   ;;  %710 = vperm.xlu1 %1729, %v2065_v29  }
 0x17c   :  { %774 = vperm.xlu0 %1728, %v2071_v33   ;;  %769 = vperm.xlu1 %1729, %v2076_v34  }
 0x180   :  { %1249 = vperm.xlu0 %1728, %v440_v45   ;;  %956 = vperm.xlu1 %1729, %v950_v35  }
 0x184   :  { %966 = vperm.xlu1 %1729, %v952_v37   ;;  %v204_v37 = vunpack.c.0.s8 %v203_v11 }
 0x188   :  { %1244 = vperm.xlu1 %1729, %v439_v55  }
 0x1d6   :  { %v140_v38 = vpop.permute.xlu1 %139 }
 0x1d7   :  { %v135_v39 = vpop.permute.xlu0 %134  ;;  %v2081_v40 = vmul.f32 %v140_v38, %v1865_v5  ;;  %v2084_v41 = vmul.f32 %v140_v38, %v1870_v6 }
 0x1d8   :  { %v2087_v42 = vmul.f32 %v135_v39, %v1843_v0  ;;  %v2090_v43 = vmul.f32 %v135_v39, %v1848_v1 }
 0x1da   :  { %v160_v5 = vadd.f32 %v2081_v40, %v2087_v42  ;;  %v169_v6 = vadd.f32 %v2084_v41, %v2090_v43 }
 0x1db   :  { %v145_v44 = vpop.permute.xlu1 %144 }
 0x1dc   :  { %v2093_v45 = vmul.f32 %v145_v44, %v1853_v2  ;;  %v2096_v46 = vmul.f32 %v145_v44, %v1860_v4 }
 0x1de   :  { %v161_v0 = vadd.f32 %v160_v5, %v2093_v45  ;;  %v170_v48 = vadd.f32 %v169_v6, %v2096_v46  ;;  %v181_v4 = vmax.f32 %v2087_v42, %v2093_v45  ;;  %v190_v49 = vmax.f32 %v2090_v43, %v2096_v46 }
 0x1df   :  { %v150_v47 = vpop.permute.xlu1 %149 }
 0x1e0   :  { %v2105_v1 = vmul.f32 %v150_v47, %v1877_v8  ;;  %v2108_v2 = vmul.f32 %v150_v47, %v1882_v9 }
 0x1e2   :  { %2923 = vst [vmem:[#allocation7_spill] sm:$0xff] %v2108_v2  ;;  %v162_v51 = vadd.f32 %v161_v0, %v2105_v1  ;;  %v171_v52 = vadd.f32 %v170_v48, %v2108_v2  ;;  %v182_v53 = vmax.f32 %v2081_v40, %v2105_v1  ;;  %v191_v8 = vmax.f32 %v2084_v41, %v2108_v2 }
 0x1e4   :  { %v163_v55 = vrot.slane %v162_v51, 4  ;;  %v172_v56 = vrot.slane %v171_v52, 4  ;;  %v183_v9 = vmax.f32 %v181_v4, %v182_v53  ;;  %v192_v57 = vmax.f32 %v190_v49, %v191_v8 }
 0x1e5   :  { %v2121_v4 = vsub.s32 %v204_v37, %v1957_v26 }
 0x1e6   :  { %v164_v60 = vadd.f32 %v163_v55, %v162_v51  ;;  %v173_v61 = vadd.f32 %v172_v56, %v171_v52  ;;  %v184_v62 = vrot.slane %v183_v9, 4  ;;  %v193_v7 = vrot.slane %v192_v57, 4 }
 0x1e8   :  { %v165_v23 = vrot.slane %v164_v60, 2  ;;  %v174_v24 = vrot.slane %v173_v61, 2  ;;  %v185_v27 = vmax.f32 %v183_v9, %v184_v62  ;;  %v194_v28 = vmax.f32 %v192_v57, %v193_v7 }
 0x1ea   :  { %v166_v30 = vadd.f32 %v165_v23, %v164_v60  ;;  %v175_v31 = vadd.f32 %v174_v24, %v173_v61  ;;  %v186_v35 = vrot.slane %v185_v27, 2  ;;  %v195_v36 = vrot.slane %v194_v28, 2  ;;  %v2148_v24 = vpop.permute.xlu1 %443 }
 0x1eb   :  { %v1786_v23 = vmov 0.0  }
 0x1ec   :  { %v167_v38 = vrot.slane %v166_v30, 1  ;;  %v176_v39 = vrot.slane %v175_v31, 1  ;;  %v187_v44 = vmax.f32 %v185_v27, %v186_v35  ;;  %v196_v5 = vmax.f32 %v194_v28, %v195_v36  ;;  %32 = vst [vmem:[#allocation2 + $0x10] sm:$0xc0] %v1786_v23  ;;  %33 = vst [vmem:[#allocation2 + $0x18] sm:$0xc0] %v1786_v23  ;;  %v2152_v28 = vpop.permute.xlu0 %448 }
 0x1ee   :  { %v168_v6 = vadd.f32 %v167_v38, %v166_v30  ;;  %v177_v47 = vadd.f32 %v176_v39, %v175_v31  ;;  %v188_v0 = vrot.slane %v187_v44, 1  ;;  %v197_v48 = vrot.slane %v196_v5, 1  ;;  %v2150_v27 = vpop.permute.xlu1 %502 }
 0x1f0   :  { %v179_v49 = vmul.f32 0.03125, %v168_v6  ;;  %v180_v51 = vmul.f32 0.03125, %v177_v47  ;;  %v189_v52 = vmax.f32 %v187_v44, %v188_v0  ;;  %v198_v53 = vmax.f32 %v196_v5, %v197_v48  ;;  %v2156_v31 = vpop.permute.xlu0 %507 }
 0x1f2   :  { %v201_v8 = vcombine.low %v179_v49, %v180_v51  ;;  %v226_v55 = vcombine.low %v189_v52, %v198_v53  ;;  %v2154_v30 = vpop.permute.xlu1 %561 }
 0x1f4   :  { %v208_v56 = vrot.slane %v201_v8, %v2121_v4  ;;  %v233_v9 = vrot.slane %v226_v55, %v2121_v4  ;;  %v2160_v36 = vpop.permute.xlu0 %566 }
 0x1f6   :  { %v215_v60 = vrot.slane %v208_v56, %v2121_v4  ;;  %v240_v61 = vrot.slane %v233_v9, %v2121_v4  ;;  %v2158_v35 = vpop.permute.xlu1 %607 }
 0x1f8   :  { %222 = vst.msk [vmem:[#allocation2 + $0x6] ss:$8 sm:$0x3] %vm2126_vm1, %v215_v60  ;;  %243 = vst.msk [vmem:[#allocation2 + $0x7] ss:$8 sm:$0x3] %vm2126_vm1, %v240_v61  ;;  %v2164_v38 = vpop.permute.xlu0 %612 }
 0x1fa   :  { %v2162_v37 = vpop.permute.xlu1 %651 }
 0x1fc   :  { %v2168_v44 = vpop.permute.xlu0 %656 }
 0x1fe   :  { %v2166_v39 = vpop.permute.xlu1 %710 }
 0x1ff   :  { %v246_v62 = vld [vmem:[#allocation2 + $0x8] sm:$0xc0]  ;;  %v245_v7 = vld [vmem:[#allocation2] sm:$0xc0] }
 0x200   :  { %v250_v10 = vrot.slane %v246_v62, 6  ;;  %v249_v11 = vrot.slane %v245_v7, 6  ;;  %v2172_v6 = vpop.permute.xlu0 %715 }
 0x202   :  { %310 = vrot.lane.b32.xlu0 %v250_v10, %s1780_s5  ;;  %253 = vrot.lane.b32.xlu1 %v249_v11, %s1781_s0  ;;  %v2170_v5 = vpop.permute.xlu1 %769 }
 0x204   :  { %v962_v0 = vpop.permute.xlu0 %961 }
 0x205   :  { %v2181_v52 = vmul.f32 %v1901_v14, %v962_v0  ;;  %v2184_v53 = vmul.f32 %v1906_v15, %v962_v0 }
 0x206   :  { %340 = vrot.lane.b32.xlu0 %v250_v10, %s1782_s17  ;;  %255 = vrot.lane.b32.xlu1 %v250_v10, %s1781_s0  ;;  %v957_v47 = vpop.permute.xlu1 %956 }
 0x207   :  { %v2175_v49 = vmul.f32 %v1891_v12, %v957_v47  ;;  %v2178_v51 = vmul.f32 %v1896_v13, %v957_v47  ;;  %2928 = vst [vmem:[#allocation10_spill] sm:$0xff] %v2181_v52  ;;  %2929 = vst [vmem:[#allocation11_spill] sm:$0xff] %v2184_v53 }
 0x208   :  { %v972_v56 = vpop.permute.xlu0 %971 }
 0x209   :  { %2926 = vst [vmem:[#allocation8_spill] sm:$0xff] %v2175_v49  ;;  %2927 = vst [vmem:[#allocation9_spill] sm:$0xff] %v2178_v51  ;;  %v982_v12 = vadd.f32 %v2181_v52, %v2175_v49  ;;  %v991_v13 = vadd.f32 %v2184_v53, %v2178_v51  ;;  %v2199_v15 = vmul.f32 %v1925_v20, %v972_v56 }
 0x20a   :  { %364 = vrot.lane.b32.xlu0 %v250_v10, %s1783_s18  ;;  %278 = vrot.lane.b32.xlu1 %v249_v11, %s1784_s19  ;;  %v967_v48 = vpop.permute.xlu1 %966 }
 0x20b   :  { %v2187_v8 = vmul.f32 %v1915_v18, %v967_v48  ;;  %v2190_v55 = vmul.f32 %v1920_v19, %v967_v48  ;;  %2932 = vst [vmem:[#allocation14_spill] sm:$0xff] %v2199_v15  ;;  %v2202_v18 = vmul.f32 %v1930_v21, %v972_v56  ;;  %v1003_v7 = vmax.f32 %v2181_v52, %v2199_v15 }
 0x20d   :  { %2930 = vst [vmem:[#allocation12_spill] sm:$0xff] %v2187_v8  ;;  %2931 = vst [vmem:[#allocation13_spill] sm:$0xff] %v2190_v55  ;;  %v983_v9 = vadd.f32 %v982_v12, %v2187_v8  ;;  %v992_v14 = vadd.f32 %v991_v13, %v2190_v55  ;;  %v1002_v19 = vmax.f32 %v2175_v49, %v2187_v8  ;;  %v2217_v13 = vand.u32 127, %v88_v17 }
 0x20e   :  { %394 = vrot.lane.b32.xlu0 %v250_v10, %s1785_s20  ;;  %280 = vrot.lane.b32.xlu1 %v250_v10, %s1784_s19  ;;  %2933 = vst [vmem:[#allocation15_spill] sm:$0xff] %v2202_v18  ;;  %v1011_v60 = vmax.f32 %v2178_v51, %v2190_v55  ;;  %v1012_v20 = vmax.f32 %v2184_v53, %v2202_v18  ;;  %v2214_v48 = vpop.permute.xlu1 %1244 }
 0x20f   :  { %v984_v61 = vadd.f32 %v983_v9, %v2199_v15  ;;  %v993_v62 = vadd.f32 %v992_v14, %v2202_v18  ;;  %v1004_v10 = vmax.f32 %v1002_v19, %v1003_v7  ;;  %2934 = vst [vmem:[#allocation16_spill] sm:$0xff] %v2214_v48  ;;  %v2220_v9 = vsub.s32 1, %v1957_v26  ;;  %v262_v19 = vld [vmem:[%s2909_s6] ss:$8 sm:$0x3] }
 0x210   :  { %vm259_vm2 = vcmp.lt.s32.totalorder %v2217_v13, 3  ;;  %vm282_vm3 = vcmp.lt.s32.totalorder %v2217_v13, 2  ;;  %vm312_vm4 = vcmp.lt.s32.totalorder %v2217_v13, 1  ;;  %vm342_vm5 = vcmp.lt.s32.totalorder %v2217_v13, 127 }
 0x211   :  { %v985_v21 = vrot.slane %v984_v61, 4  ;;  %v994_v23 = vrot.slane %v993_v62, 4  ;;  %v1005_v47 = vrot.slane %v1004_v10, 4  ;;  %v271_v17 = vrot.slane %v262_v19, %v2220_v9 }
 0x212   :  { %308 = vrot.lane.b32.xlu1 %v249_v11, %s1780_s5  ;;  %vm366_vm6 = vcmp.lt.s32.totalorder %v2217_v13, 126  ;;  %vm396_vm7 = vcmp.lt.s32.totalorder %v2217_v13, 125  ;;  %vm434_vm8 = vcmp.lt.s32.totalorder %v2217_v13, 48  ;;  %vm492_vm9 = vcmp.lt.s32.totalorder %v2217_v13, 32 }
 0x213   :  { %v986_v56 = vadd.f32 %v985_v21, %v984_v61  ;;  %v995_v12 = vadd.f32 %v994_v23, %v993_v62  ;;  %v1006_v14 = vmax.f32 %v1004_v10, %v1005_v47  ;;  %v267_v61 = vrot.slane %v262_v19, %v1963_v32  ;;  %v1657_v19 = vld [vmem:[%s2909_s6 + $0x1] ss:$8 sm:$0x3] }
 0x214   :  { %vm551_vm10 = vcmp.lt.s32.totalorder %v2217_v13, 16  ;;  %vm641_vm11 = vcmp.lt.s32.totalorder %v2217_v13, 112  ;;  %vm700_vm12 = vcmp.lt.s32.totalorder %v2217_v13, 96  ;;  %vm759_vm13 = vcmp.lt.s32.totalorder %v2217_v13, 80 }
 0x215   :  { %v987_v7 = vrot.slane %v986_v56, 2  ;;  %v1007_v62 = vrot.slane %v1006_v14, 2  ;;  %v1704_v13 = vld [vmem:[%s2909_s6 + $0x13] ss:$8 sm:$0x3] }
 0x216   :  { %338 = vrot.lane.b32.xlu1 %v249_v11, %s1782_s17 }
 0x217   :  { %v988_v21 = vadd.f32 %v987_v7, %v986_v56  ;;  %v1008_v15 = vmax.f32 %v1006_v14, %v1007_v62 }
 0x219   :  { %v989_v52 = vrot.slane %v988_v21, 1 }
 0x21a   :  { %362 = vrot.lane.b32.xlu1 %v249_v11, %s1783_s18 }
 0x21b   :  { %v990_v14 = vadd.f32 %v989_v52, %v988_v21  ;;  %v1659_v52 = vld [vmem:[%s2909_s6 + $0x4] ss:$8 sm:$0x3] }
 0x21d   :  { %v1000_v21 = vmul.f32 0.03125, %v990_v14 }
 0x21e   :  { %392 = vrot.lane.b32.xlu1 %v249_v11, %s1785_s20  ;;  %v1013_v11 = vmax.f32 %v1011_v60, %v1012_v20  ;;  %v2225_v60 = vpop.permute.xlu0 %774  ;;  %v996_v20 = vrot.slane %v995_v12, 2 }
 0x220   :  { %v1014_v0 = vrot.slane %v1013_v11, 4  ;;  %v997_v10 = vadd.f32 %v996_v20, %v995_v12  ;;  %v295_v20 = vrot.slane %v1657_v19, %v2220_v9 }
 0x222   :  { %v1015_v55 = vmax.f32 %v1013_v11, %v1014_v0  ;;  %v2234_v0 = vpop.permute.xlu0 %1249  ;;  %v998_v56 = vrot.slane %v997_v10, 1 }
 0x223   :  { %2935 = vst [vmem:[#allocation17_spill] sm:$0xff] %v2234_v0 }
 0x224   :  { %v1016_v26 = vrot.slane %v1015_v55, 2  ;;  %v999_v62 = vadd.f32 %v998_v56, %v997_v10 }
 0x226   :  { %v1017_v8 = vmax.f32 %v1015_v55, %v1016_v26  ;;  %v1658_v55 = vld [vmem:[%s2909_s6 + $0x2] ss:$8 sm:$0x3]  ;;  %v1001_v10 = vmul.f32 0.03125, %v999_v62 }
 0x228   :  { %v1022_v14 = vcombine.low %v1000_v21, %v1001_v10 }
 0x274   :  { %v254_v51 = vpop.permute.xlu1 %253  ;;  %v311_v7 = vpop.permute.xlu0 %310 }
 0x278   :  { %v256_v11 = vpop.permute.xlu1 %255  ;;  %v341_v56 = vpop.permute.xlu0 %340 }
 0x279   :  { %v260_v23 = vsel %vm259_vm2, %v254_v51, %v256_v11  ;;  %v261_v47 = vsel %vm259_vm2, %v256_v11, %v254_v51  ;;  %v291_v51 = vrot.slane %v1657_v19, %v1963_v32  ;;  %v325_v19 = vrot.slane %v1658_v55, %v2220_v9 }
 0x27a   :  { %v274_v18 = vmul.f32 %v267_v61, %v261_v47  ;;  %v275_v53 = vmul.f32 %v271_v17, %v260_v23  ;;  %v1009_v61 = vrot.slane %v1008_v15, 1  ;;  %v1018_v17 = vrot.slane %v1017_v8, 1 }
 0x27b   :  { %v321_v47 = vrot.slane %v1658_v55, %v1963_v32  ;;  %v1660_v55 = vld [vmem:[%s2909_s6 + $0x5] ss:$8 sm:$0x3] }
 0x27c   :  { %276 = vst [vmem:[#allocation2] sm:$0x3] %v274_v18  ;;  %277 = vst [vmem:[#allocation2 + $0x8] sm:$0x3] %v275_v53  ;;  %v279_v12 = vpop.permute.xlu1 %278  ;;  %v1010_v49 = vmax.f32 %v1008_v15, %v1009_v61  ;;  %v1019_v48 = vmax.f32 %v1017_v8, %v1018_v17  ;;  %v351_v61 = vrot.slane %v1659_v52, %v1963_v32 }
 0x27d   :  { %v355_v17 = vrot.slane %v1659_v52, %v2220_v9 }
 0x27e   :  { %v1042_v62 = vcombine.low %v1010_v49, %v1019_v48  ;;  %v379_v49 = vrot.slane %v1660_v55, %v2220_v9  ;;  %v1661_v48 = vld [vmem:[%s2909_s6 + $0x6] ss:$8 sm:$0x3] }
 0x280   :  { %v281_v26 = vpop.permute.xlu1 %280  ;;  %v1049_v52 = vrot.slane %v1042_v62, %v2121_v4 }
 0x281   :  { %v283_v53 = vsel %vm282_vm3, %v279_v12, %v281_v26  ;;  %v284_v18 = vsel %vm282_vm3, %v281_v26, %v279_v12 }
 0x282   :  { %v298_v11 = vmul.f32 %v291_v51, %v284_v18  ;;  %v299_v23 = vmul.f32 %v295_v20, %v283_v53 }
 0x284   :  { %v302_v0 = vrot.slane %v298_v11, 6  ;;  %v303_v2 = vrot.slane %v299_v23, 6  ;;  %v309_v12 = vpop.permute.xlu1 %308 }
 0x285   :  { %v313_v51 = vsel %vm312_vm4, %v309_v12, %v311_v7  ;;  %v314_v20 = vsel %vm312_vm4, %v311_v7, %v309_v12 }
 0x286   :  { %306 = vst [vmem:[#allocation2] sm:$0xc] %v302_v0  ;;  %307 = vst [vmem:[#allocation2 + $0x8] sm:$0xc] %v303_v2  ;;  %v328_v8 = vmul.f32 %v321_v47, %v314_v20  ;;  %v329_v15 = vmul.f32 %v325_v19, %v313_v51  ;;  %v365_v0 = vpop.permute.xlu0 %364  ;;  %v375_v47 = vrot.slane %v1660_v55, %v1963_v32 }
 0x287   :  { %v1029_v19 = vrot.slane %v1022_v14, %v2121_v4  ;;  %v405_v20 = vrot.slane %v1661_v48, %v1963_v32 }
 0x288   :  { %v332_v26 = vrot.slane %v328_v8, 4  ;;  %v333_v53 = vrot.slane %v329_v15, 4  ;;  %v339_v18 = vpop.permute.xlu1 %338  ;;  %v409_v8 = vrot.slane %v1661_v48, %v2220_v9 }
 0x289   :  { %v343_v7 = vsel %vm342_vm5, %v339_v18, %v341_v56  ;;  %v344_v2 = vsel %vm342_vm5, %v341_v56, %v339_v18  ;;  %v1036_v15 = vrot.slane %v1029_v19, %v2121_v4 }
 0x28a   :  { %336 = vst [vmem:[#allocation2] sm:$0x30] %v332_v26  ;;  %337 = vst [vmem:[#allocation2 + $0x8] sm:$0x30] %v333_v53  ;;  %v358_v11 = vmul.f32 %v351_v61, %v343_v7  ;;  %v359_v23 = vmul.f32 %v355_v17, %v344_v2  ;;  %v1056_v61 = vrot.slane %v1049_v52, %v2121_v4  ;;  %v395_v17 = vpop.permute.xlu0 %394 }
 0x28c   :  { %360 = vst [vmem:[#allocation2 + $0x10] sm:$0x3] %v358_v11  ;;  %361 = vst [vmem:[#allocation2 + $0x18] sm:$0x3] %v359_v23  ;;  %v363_v21 = vpop.permute.xlu1 %362 }
 0x28d   :  { %v367_v10 = vsel %vm366_vm6, %v363_v21, %v365_v0  ;;  %v368_v56 = vsel %vm366_vm6, %v365_v0, %v363_v21 }
 0x28e   :  { %v382_v12 = vmul.f32 %v375_v47, %v367_v10  ;;  %v383_v51 = vmul.f32 %v379_v49, %v368_v56 }
 0x290   :  { %v386_v55 = vrot.slane %v382_v12, 6  ;;  %v387_v14 = vrot.slane %v383_v51, 6  ;;  %v393_v62 = vpop.permute.xlu1 %392 }
 0x291   :  { %v397_v26 = vsel %vm396_vm7, %v393_v62, %v395_v17  ;;  %v398_v53 = vsel %vm396_vm7, %v395_v17, %v393_v62  ;;  %v2290_v18 = vld [vmem:[#allocation2] sm:$0xff]  ;;  %v2292_v7 = vld [vmem:[#allocation2 + $0x8] sm:$0xff] }
 0x292   :  { %390 = vst [vmem:[#allocation2 + $0x10] sm:$0xc] %v386_v55  ;;  %391 = vst [vmem:[#allocation2 + $0x18] sm:$0xc] %v387_v14  ;;  %v412_v2 = vmul.f32 %v405_v20, %v397_v26  ;;  %v413_v0 = vmul.f32 %v409_v8, %v398_v53  ;;  %426 = vrot.lane.b32.xlu1 %v2290_v18, %s1787_s10 }
 0x293   :  { %1038 = vst.msk [vmem:[#allocation2 + $0x6] ss:$8 sm:$0x3] %vm2126_vm1, %v1036_v15  ;;  %1058 = vst.msk [vmem:[#allocation2 + $0x7] ss:$8 sm:$0x3] %vm2126_vm1, %v1056_v61 }
 0x294   :  { %v416_v4 = vrot.slane %v412_v2, 4  ;;  %v417_v11 = vrot.slane %v413_v0, 4 }
 0x296   :  { %420 = vst [vmem:[#allocation2 + $0x10] sm:$0x30] %v416_v4  ;;  %421 = vst [vmem:[#allocation2 + $0x18] sm:$0x30] %v417_v11  ;;  %430 = vrot.lane.b32.xlu1 %v2292_v7, %s1787_s10 }
 0x29a   :  { %484 = vrot.lane.b32.xlu1 %v2290_v18, %s1788_s2  ;;  %v1060_v57 = vld [vmem:[#allocation2] sm:$0xc0]  ;;  %v1061_v48 = vld [vmem:[#allocation2 + $0x8] sm:$0xc0] }
 0x29b   :  { %v1064_v49 = vrot.slane %v1060_v57, 6  ;;  %v1065_v19 = vrot.slane %v1061_v48, 6 }
 0x29d   :  { %v424_v23 = vld [vmem:[#allocation2 + $0x10] sm:$0xff]  ;;  %v425_v47 = vld [vmem:[#allocation2 + $0x18] sm:$0xff] }
 0x29e   :  { %488 = vrot.lane.b32.xlu1 %v2292_v7, %s1788_s2  ;;  %428 = vrot.lane.b32.xlu0 %v424_v23, %s1787_s10 }
 0x2a2   :  { %543 = vrot.lane.b32.xlu1 %v2290_v18, %s1789_s3  ;;  %432 = vrot.lane.b32.xlu0 %v425_v47, %s1787_s10 }
 0x2a6   :  { %547 = vrot.lane.b32.xlu1 %v2292_v7, %s1789_s3  ;;  %486 = vrot.lane.b32.xlu0 %v424_v23, %s1788_s2 }
 0x2aa   :  { %633 = vrot.lane.b32.xlu1 %v2290_v18, %s1790_s11  ;;  %490 = vrot.lane.b32.xlu0 %v425_v47, %s1788_s2 }
 0x2ae   :  { %637 = vrot.lane.b32.xlu1 %v2292_v7, %s1790_s11  ;;  %545 = vrot.lane.b32.xlu0 %v424_v23, %s1789_s3 }
 0x2b2   :  { %692 = vrot.lane.b32.xlu1 %v2290_v18, %s1791_s12  ;;  %549 = vrot.lane.b32.xlu0 %v425_v47, %s1789_s3 }
 0x2b6   :  { %696 = vrot.lane.b32.xlu1 %v2292_v7, %s1791_s12  ;;  %635 = vrot.lane.b32.xlu0 %v424_v23, %s1790_s11 }
 0x2ba   :  { %751 = vrot.lane.b32.xlu1 %v2290_v18, %s1792_s13  ;;  %639 = vrot.lane.b32.xlu0 %v425_v47, %s1790_s11 }
 0x2be   :  { %755 = vrot.lane.b32.xlu1 %v2292_v7, %s1792_s13  ;;  %694 = vrot.lane.b32.xlu0 %v424_v23, %s1791_s12 }
 0x2c2   :  { %1090 = vrot.lane.b32.xlu1 %v1064_v49, %s1784_s19  ;;  %698 = vrot.lane.b32.xlu0 %v425_v47, %s1791_s12 }
 0x2c6   :  { %1118 = vrot.lane.b32.xlu1 %v1064_v49, %s1780_s5  ;;  %753 = vrot.lane.b32.xlu0 %v424_v23, %s1792_s13 }
 0x2ca   :  { %1168 = vrot.lane.b32.xlu1 %v1064_v49, %s1783_s18  ;;  %757 = vrot.lane.b32.xlu0 %v425_v47, %s1792_s13 }
 0x2ce   :  { %1196 = vrot.lane.b32.xlu1 %v1064_v49, %s1785_s20  ;;  %1092 = vrot.lane.b32.xlu0 %v1065_v19, %s1784_s19 }
 0x2d2   :  { %1068 = vrot.lane.b32.xlu1 %v1064_v49, %s1781_s0  ;;  %1120 = vrot.lane.b32.xlu0 %v1065_v19, %s1780_s5 }
 0x2d6   :  { %1146 = vrot.lane.b32.xlu1 %v1064_v49, %s1782_s17  ;;  %1170 = vrot.lane.b32.xlu0 %v1065_v19, %s1783_s18 }
 0x2da   :  { %1300 = vperm.xlu1 %1729, %v2028_v59   ;;  %1198 = vrot.lane.b32.xlu0 %v1065_v19, %s1785_s20 }
 0x2de   :  { %1356 = vperm.xlu1 %1729, %v2040_v3   ;;  %1070 = vrot.lane.b32.xlu0 %v1065_v19, %s1781_s0 }
 0x2e2   :  { %1442 = vperm.xlu1 %1729, %v2059_v25   ;;  %1305 = vperm.xlu0 %1728, %v2008_v50   ;;  %v618_v25 = vmul.f32 %v2164_v38, %v425_v47 }
 0x2e6   :  { %1498 = vperm.xlu1 %1729, %v2065_v29   ;;  %1148 = vrot.lane.b32.xlu0 %v1065_v19, %s1782_s17  ;;  %v617_v29 = vmul.f32 %v2164_v38, %v424_v23 }
 0x2ea   :  { %1400 = vperm.xlu1 %1729, %v2052_v22   ;;  %1361 = vperm.xlu0 %1728, %v2014_v54   ;;  %v615_v54 = vmul.f32 %v2158_v35, %v2290_v18  ;;  %v616_v22 = vmul.f32 %v2158_v35, %v2292_v7 }
 0x2ec   :  { %v619_v52 = vadd.f32 %v617_v29, %v615_v54  ;;  %v2401_v54 = vld [vmem:[%s2909_s6 + $0x10] ss:$8 sm:$0x3] }
 0x2ee   :  { %1554 = vperm.xlu1 %1729, %v2076_v34   ;;  %1447 = vperm.xlu0 %1728, %v2035_v63   ;;  %v620_v10 = vrot.slane %v619_v52, 4 }
 0x2f0   :  { %v621_v20 = vadd.f32 %v620_v10, %v619_v52 }
 0x2f2   :  { %1503 = vperm.xlu0 %1728, %v2047_v16   ;;  %v626_v16 = vadd.f32 %v618_v25, %v616_v22  ;;  %v622_v18 = vrot.slane %v621_v20, 2 }
 0x2f4   :  { %v623_v25 = vadd.f32 %v622_v18, %v621_v20  ;;  %v538_v20 = vrot.slane %v2401_v54, %v2220_v9 }
 0x2f6   :  { %1405 = vperm.xlu0 %1728, %v2023_v58  }
 0x2fa   :  { %1559 = vperm.xlu0 %1728, %v2071_v33   ;;  %v627_v33 = vrot.slane %v626_v16, 4 }
 0x2fc   :  { %v628_v51 = vadd.f32 %v627_v33, %v626_v16 }
 0x2fe   :  { %v629_v53 = vrot.slane %v628_v51, 2 }
 0x304   :  { %v427_v59 = vpop.permute.xlu1 %426 }
 0x308   :  { %v431_v50 = vpop.permute.xlu1 %430 }
 0x309   :  { %v435_v8 = vsel %vm434_vm8, %v427_v59, %v431_v50  ;;  %v437_v15 = vsel %vm434_vm8, %v431_v50, %v427_v59 }
 0x30a   :  { %v451_v7 = vmul.f32 %v2148_v24, %v437_v15  ;;  %v452_v2 = vmul.f32 %v2148_v24, %v435_v8  ;;  %v2393_v24 = vld [vmem:[%s2909_s6 + $0x7] ss:$8 sm:$0x3] }
 0x30c   :  { %v485_v3 = vpop.permute.xlu1 %484 }
 0x310   :  { %v489_v63 = vpop.permute.xlu1 %488  ;;  %v429_v34 = vpop.permute.xlu0 %428 }
 0x311   :  { %v493_v61 = vsel %vm492_vm9, %v485_v3, %v489_v63  ;;  %v495_v17 = vsel %vm492_vm9, %v489_v63, %v485_v3  ;;  %v630_v3 = vadd.f32 %v629_v53, %v628_v51  ;;  %v534_v51 = vrot.slane %v2401_v54, %v1963_v32 }
 0x312   :  { %v510_v11 = vmul.f32 %v2150_v27, %v495_v17  ;;  %v511_v23 = vmul.f32 %v2150_v27, %v493_v61  ;;  %v475_v27 = vrot.slane %v2393_v24, %v1963_v32 }
 0x313   :  { %v631_v16 = vrot.slane %v630_v3, 1 }
 0x314   :  { %v544_v58 = vpop.permute.xlu1 %543  ;;  %v433_v21 = vpop.permute.xlu0 %432 }
 0x315   :  { %v436_v38 = vsel %vm434_vm8, %v429_v34, %v433_v21  ;;  %v438_v56 = vsel %vm434_vm8, %v433_v21, %v429_v34  ;;  %v624_v21 = vrot.slane %v623_v25, 1 }
 0x316   :  { %v453_v55 = vmul.f32 %v2152_v28, %v438_v56  ;;  %v454_v14 = vmul.f32 %v2152_v28, %v436_v38 }
 0x318   :  { %v548_v12 = vpop.permute.xlu1 %547  ;;  %v487_v35 = vpop.permute.xlu0 %486  ;;  %v455_v57 = vadd.f32 %v453_v55, %v451_v7  ;;  %v462_v49 = vadd.f32 %v454_v14, %v452_v2  ;;  %v2433_v7 = vld [vmem:[%s2909_s6 + $0x13] ss:$8 sm:$0x3] }
 0x319   :  { %v552_v33 = vsel %vm551_vm10, %v544_v58, %v548_v12  ;;  %v554_v10 = vsel %vm551_vm10, %v548_v12, %v544_v58  ;;  %v2423_v58 = vld [vmem:[%s2909_s6 + $0x11] ss:$8 sm:$0x3] }
 0x31a   :  { %v456_v29 = vrot.slane %v455_v57, 4  ;;  %v569_v17 = vmul.f32 %v2154_v30, %v554_v10  ;;  %v570_v55 = vmul.f32 %v2154_v30, %v552_v33  ;;  %v2446_v30 = vld [vmem:[%s2909_s6 + $0x14] ss:$8 sm:$0x3] }
 0x31c   :  { %v634_v62 = vpop.permute.xlu1 %633  ;;  %v491_v26 = vpop.permute.xlu0 %490  ;;  %v457_v12 = vadd.f32 %v456_v29, %v455_v57 }
 0x31d   :  { %v494_v0 = vsel %vm492_vm9, %v487_v35, %v491_v26  ;;  %v496_v4 = vsel %vm492_vm9, %v491_v26, %v487_v35  ;;  %v479_v35 = vrot.slane %v2393_v24, %v2220_v9 }
 0x31e   :  { %v512_v28 = vmul.f32 %v2156_v31, %v496_v4  ;;  %v513_v47 = vmul.f32 %v2156_v31, %v494_v0  ;;  %v463_v31 = vrot.slane %v462_v49, 4  ;;  %v2439_v0 = vadd.f32 %v631_v16, %v630_v3 }
 0x31f   :  { %v2441_v4 = vadd.f32 %v624_v21, %v623_v25  ;;  %v458_v57 = vrot.slane %v457_v12, 2  ;;  %v2476_v21 = vld [vmem:[%s2909_s6 + $0x2] ss:$8 sm:$0x3] }
 0x320   :  { %v514_v48 = vadd.f32 %v512_v28, %v510_v11  ;;  %v521_v19 = vadd.f32 %v513_v47, %v511_v23  ;;  %v638_v59 = vpop.permute.xlu1 %637  ;;  %v546_v50 = vpop.permute.xlu0 %545  ;;  %v464_v8 = vadd.f32 %v463_v31, %v462_v49 }
 0x321   :  { %v642_v11 = vsel %vm641_vm11, %v634_v62, %v638_v59  ;;  %v644_v23 = vsel %vm641_vm11, %v638_v59, %v634_v62  ;;  %v2465_v59 = vld [vmem:[%s2909_s6 + $0x1] ss:$8 sm:$0x3] }
 0x322   :  { %v515_v22 = vrot.slane %v514_v48, 4  ;;  %v522_v63 = vrot.slane %v521_v19, 4  ;;  %v465_v49 = vrot.slane %v464_v8, 2 }
 0x324   :  { %v2403_v34 = vpop.permute.xlu1 %692  ;;  %v550_v52 = vpop.permute.xlu0 %549  ;;  %v516_v14 = vadd.f32 %v515_v22, %v514_v48  ;;  %v523_v26 = vadd.f32 %v522_v63, %v521_v19  ;;  %v659_v22 = vmul.f32 %v2162_v37, %v642_v11  ;;  %v660_v63 = vmul.f32 %v2162_v37, %v644_v23  ;;  %v2483_v37 = vld [vmem:[%s2909_s6 + $0x15] ss:$8 sm:$0x3] }
 0x325   :  { %v553_v38 = vsel %vm551_vm10, %v546_v50, %v550_v52  ;;  %v555_v56 = vsel %vm551_vm10, %v550_v52, %v546_v50 }
 0x326   :  { %v571_v15 = vmul.f32 %v2160_v36, %v555_v56  ;;  %v572_v61 = vmul.f32 %v2160_v36, %v553_v38  ;;  %v517_v50 = vrot.slane %v516_v14, 2  ;;  %v524_v3 = vrot.slane %v523_v26, 2 }
 0x328   :  { %v697_v53 = vpop.permute.xlu1 %696  ;;  %v636_v18 = vpop.permute.xlu0 %635  ;;  %v573_v28 = vadd.f32 %v571_v15, %v569_v17  ;;  %v580_v47 = vadd.f32 %v572_v61, %v570_v55  ;;  %v459_v15 = vadd.f32 %v458_v57, %v457_v12  ;;  %v466_v61 = vadd.f32 %v465_v49, %v464_v8 }
 0x329   :  { %v525_v11 = vadd.f32 %v524_v3, %v523_v26  ;;  %v703_v3 = vsel %vm700_vm12, %v697_v53, %v2403_v34  ;;  %v2529_v26 = vld [vmem:[%s2909_s6] ss:$8 sm:$0x3] }
 0x32a   :  { %v574_v33 = vrot.slane %v573_v28, 4  ;;  %v581_v10 = vrot.slane %v580_v47, 4  ;;  %v1079_v17 = vrot.slane %v2529_v26, %v1963_v32 }
 0x32c   :  { %v2456_v25 = vpop.permute.xlu1 %751  ;;  %v640_v29 = vpop.permute.xlu0 %639  ;;  %v575_v57 = vadd.f32 %v574_v33, %v573_v28  ;;  %v582_v49 = vadd.f32 %v581_v10, %v580_v47  ;;  %v2516_v28 = vld [vmem:[%s2909_s6 + $0x6] ss:$8 sm:$0x3]  ;;  %v526_v33 = vrot.slane %v525_v11, 1 }
 0x32d   :  { %v643_v16 = vsel %vm641_vm11, %v636_v18, %v640_v29  ;;  %v645_v52 = vsel %vm641_vm11, %v640_v29, %v636_v18  ;;  %v518_v18 = vadd.f32 %v517_v50, %v516_v14  ;;  %v701_v50 = vsel %vm700_vm12, %v2403_v34, %v697_v53 }
 0x32e   :  { %v661_v38 = vmul.f32 %v2168_v44, %v643_v16  ;;  %v662_v56 = vmul.f32 %v2168_v44, %v645_v52  ;;  %v2493_v16 = vld [vmem:[%s2909_s6 + $0x5] ss:$8 sm:$0x3]  ;;  %v467_v52 = vrot.slane %v466_v61, 1  ;;  %v718_v34 = vmul.f32 %v2166_v39, %v701_v50 }
 0x32f   :  { %v519_v47 = vrot.slane %v518_v18, 1  ;;  %v719_v53 = vmul.f32 %v2166_v39, %v703_v3  ;;  %v576_v62 = vrot.slane %v575_v57, 2  ;;  %v583_v31 = vrot.slane %v582_v49, 2 }
 0x330   :  { %v663_v23 = vadd.f32 %v661_v38, %v659_v22  ;;  %v670_v29 = vadd.f32 %v662_v56, %v660_v63  ;;  %v695_v44 = vpop.permute.xlu0 %694  ;;  %v756_v22 = vpop.permute.xlu1 %755  ;;  %v460_v63 = vrot.slane %v459_v15, 1  ;;  %v468_v14 = vadd.f32 %v467_v52, %v466_v61 }
 0x331   :  { %v1211_v3 = vrot.slane %v2516_v28, %v2220_v9  ;;  %v577_v61 = vadd.f32 %v576_v62, %v575_v57 }
 0x332   :  { %v664_v10 = vrot.slane %v663_v23, 4  ;;  %v671_v8 = vrot.slane %v670_v29, 4  ;;  %v461_v50 = vadd.f32 %v460_v63, %v459_v15  ;;  %v1083_v15 = vrot.slane %v2529_v26, %v2220_v9 }
 0x333   :  { %v584_v63 = vadd.f32 %v583_v31, %v582_v49  ;;  %v762_v31 = vsel %vm759_vm13, %v756_v22, %v2456_v25 }
 0x334   :  { %v699_v12 = vpop.permute.xlu0 %698  ;;  %v1091_v36 = vpop.permute.xlu1 %1090 }
 0x335   :  { %v702_v19 = vsel %vm700_vm12, %v695_v44, %v699_v12  ;;  %v704_v48 = vsel %vm700_vm12, %v699_v12, %v695_v44  ;;  %v665_v44 = vadd.f32 %v664_v10, %v663_v23  ;;  %v672_v12 = vadd.f32 %v671_v8, %v670_v29 }
 0x336   :  { %v720_v56 = vmul.f32 %v2172_v6, %v702_v19  ;;  %v721_v38 = vmul.f32 %v2172_v6, %v704_v48  ;;  %v520_v6 = vadd.f32 %v519_v47, %v518_v18  ;;  %v527_v48 = vadd.f32 %v526_v33, %v525_v11 }
 0x337   :  { %v2542_v23 = vmul.f32 %v475_v27, %v461_v50  ;;  %v2547_v18 = vmul.f32 %v479_v35, %v468_v14  ;;  %v760_v11 = vsel %vm759_vm13, %v2456_v25, %v756_v22  ;;  %v666_v62 = vrot.slane %v665_v44, 2 }
 0x338   :  { %v722_v2 = vadd.f32 %v720_v56, %v718_v34  ;;  %v729_v19 = vadd.f32 %v721_v38, %v719_v53  ;;  %v754_v55 = vpop.permute.xlu0 %753  ;;  %v673_v29 = vrot.slane %v672_v12, 2  ;;  %v2558_v27 = vmul.f32 %v534_v51, %v520_v6  ;;  %v1119_v56 = vpop.permute.xlu1 %1118 }
 0x339   :  { %v2563_v24 = vmul.f32 %v538_v20, %v527_v48  ;;  %v578_v14 = vrot.slane %v577_v61, 1  ;;  %v777_v47 = vmul.f32 %v2170_v5, %v760_v11  ;;  %v778_v51 = vmul.f32 %v2170_v5, %v762_v31 }
 0x33a   :  { %v723_v52 = vrot.slane %v722_v2, 4  ;;  %v730_v39 = vrot.slane %v729_v19, 4  ;;  %v667_v20 = vadd.f32 %v666_v62, %v665_v44  ;;  %v674_v10 = vadd.f32 %v673_v29, %v672_v12 }
 0x33b   :  { %v579_v48 = vadd.f32 %v578_v14, %v577_v61  ;;  %v2936_v5 = vrot.slane %v2465_v59, %v1963_v32 }
 0x33c   :  { %v724_v8 = vadd.f32 %v723_v52, %v722_v2  ;;  %v731_v57 = vadd.f32 %v730_v39, %v729_v19  ;;  %v758_v49 = vpop.permute.xlu0 %757  ;;  %v585_v2 = vrot.slane %v584_v63, 1 }
 0x33d   :  { %v761_v35 = vsel %vm759_vm13, %v754_v55, %v758_v49  ;;  %v763_v25 = vsel %vm759_vm13, %v758_v49, %v754_v55  ;;  %v1169_v49 = vpop.permute.xlu1 %1168 }
 0x33e   :  { %v725_v22 = vrot.slane %v724_v8, 2  ;;  %v732_v38 = vrot.slane %v731_v57, 2  ;;  %v779_v33 = vmul.f32 %v2225_v60, %v761_v35  ;;  %v780_v54 = vmul.f32 %v2225_v60, %v763_v25 }
 0x33f   :  { %v586_v52 = vadd.f32 %v585_v2, %v584_v63  ;;  %v2937_v60 = vrot.slane %v2465_v59, %v2220_v9  ;;  %v2938_v59 = vrot.slane %v2423_v58, %v1963_v32 }
 0x340   :  { %v726_v34 = vadd.f32 %v725_v22, %v724_v8  ;;  %v733_v53 = vadd.f32 %v732_v38, %v731_v57  ;;  %v1093_v50 = vpop.permute.xlu0 %1092  ;;  %v781_v39 = vadd.f32 %v779_v33, %v777_v47  ;;  %v788_v55 = vadd.f32 %v780_v54, %v778_v51 }
 0x341   :  { %v1094_v19 = vsel %vm282_vm3, %v1091_v36, %v1093_v50  ;;  %v1095_v6 = vsel %vm282_vm3, %v1093_v50, %v1091_v36  ;;  %v668_v8 = vrot.slane %v667_v20, 1  ;;  %v675_v57 = vrot.slane %v674_v10, 1 }
 0x342   :  { %v1108_v11 = vmul.f32 %v2936_v5, %v1095_v6  ;;  %v1109_v44 = vmul.f32 %v2937_v60, %v1094_v19  ;;  %v727_v12 = vrot.slane %v726_v34, 1  ;;  %v734_v31 = vrot.slane %v733_v53, 1 }
 0x343   :  { %v782_v62 = vrot.slane %v781_v39, 4  ;;  %v789_v29 = vrot.slane %v788_v55, 4  ;;  %v600_v22 = vmul.f32 %v2938_v59, %v579_v48  ;;  %v2939_v38 = vrot.slane %v2423_v58, %v2220_v9 }
 0x344   :  { %v1112_v35 = vrot.slane %v1108_v11, 6  ;;  %v1113_v25 = vrot.slane %v1109_v44, 6  ;;  %v1121_v36 = vpop.permute.xlu0 %1120  ;;  %v2940_v51 = vrot.slane %v2476_v21, %v1963_v32  ;;  %v2941_v54 = vrot.slane %v2476_v21, %v2220_v9 }
 0x345   :  { %v783_v61 = vadd.f32 %v782_v62, %v781_v39  ;;  %v790_v63 = vadd.f32 %v789_v29, %v788_v55  ;;  %v1122_v14 = vsel %vm312_vm4, %v1119_v56, %v1121_v36  ;;  %v1123_v2 = vsel %vm312_vm4, %v1121_v36, %v1119_v56 }
 0x346   :  { %v601_v47 = vmul.f32 %v2939_v38, %v586_v52  ;;  %1116 = vst [vmem:[#allocation2] sm:$0xc] %v1112_v35  ;;  %1117 = vst [vmem:[#allocation2 + $0x8] sm:$0xc] %v1113_v25  ;;  %v1136_v33 = vmul.f32 %v2940_v51, %v1123_v2  ;;  %v1137_v50 = vmul.f32 %v2941_v54, %v1122_v14 }
 0x347   :  { %v728_v39 = vadd.f32 %v727_v12, %v726_v34  ;;  %v735_v56 = vadd.f32 %v734_v31, %v733_v53  ;;  %v784_v55 = vrot.slane %v783_v61, 2  ;;  %v791_v19 = vrot.slane %v790_v63, 2  ;;  %v1197_v53 = vpop.permute.xlu1 %1196 }
 0x348   :  { %v669_v6 = vadd.f32 %v668_v8, %v667_v20  ;;  %v676_v48 = vadd.f32 %v675_v57, %v674_v10  ;;  %v1140_v5 = vrot.slane %v1136_v33, 4  ;;  %v1141_v11 = vrot.slane %v1137_v50, 4  ;;  %v1171_v58 = vpop.permute.xlu0 %1170 }
 0x349   :  { %v785_v52 = vadd.f32 %v784_v55, %v783_v61  ;;  %v792_v60 = vadd.f32 %v791_v19, %v790_v63  ;;  %v1172_v44 = vsel %vm366_vm6, %v1169_v49, %v1171_v58  ;;  %v1173_v62 = vsel %vm366_vm6, %v1171_v58, %v1169_v49 }
 0x34a   :  { %v812_v21 = vadd.f32 %v2441_v4, %v600_v22  ;;  %v813_v34 = vadd.f32 %v2439_v0, %v601_v47  ;;  %1144 = vst [vmem:[#allocation2] sm:$0x30] %v1140_v5  ;;  %1145 = vst [vmem:[#allocation2 + $0x8] sm:$0x30] %v1141_v11  ;;  %v2942_v20 = vrot.slane %v2493_v16, %v1963_v32  ;;  %v2650_v58 = vstv %s2910_s7 }
 0x34b   :  { %v2943_v12 = vrot.slane %v2493_v16, %v2220_v9  ;;  %v2944_v29 = vrot.slane %v2446_v30, %v1963_v32  ;;  %v2945_v4 = vrot.slane %v2446_v30, %v2220_v9  ;;  %v786_v0 = vrot.slane %v785_v52, 1  ;;  %v1069_v55 = vpop.permute.xlu1 %1068 }
 0x34c   :  { %v1186_v10 = vmul.f32 %v2942_v20, %v1172_v44  ;;  %v793_v49 = vrot.slane %v792_v60, 1  ;;  %v2946_v35 = vrot.slane %v2433_v7, %v1963_v32  ;;  %v2947_v36 = vrot.slane %v2433_v7, %v2220_v9  ;;  %v1199_v14 = vpop.permute.xlu0 %1198 }
 0x34d   :  { %v1187_v31 = vmul.f32 %v2943_v12, %v1173_v62  ;;  %v749_v8 = vmul.f32 %v2944_v29, %v728_v39  ;;  %v750_v57 = vmul.f32 %v2945_v4, %v735_v56  ;;  %v787_v2 = vadd.f32 %v786_v0, %v785_v52 }
 0x34e   :  { %v690_v25 = vmul.f32 %v2946_v35, %v669_v6  ;;  %v691_v61 = vmul.f32 %v2947_v36, %v676_v48  ;;  %v1190_v16 = vrot.slane %v1186_v10, 6  ;;  %v794_v59 = vadd.f32 %v793_v49, %v792_v60 }
 0x34f   :  { %v1191_v63 = vrot.slane %v1187_v31, 6  ;;  %v1200_v22 = vsel %vm396_vm7, %v1197_v53, %v1199_v14  ;;  %v1201_v30 = vsel %vm396_vm7, %v1199_v14, %v1197_v53  ;;  %v810_v38 = vadd.f32 %v2558_v27, %v2542_v23  ;;  %v1147_v20 = vpop.permute.xlu1 %1146 }
 0x350   :  { %v811_v47 = vadd.f32 %v2563_v24, %v2547_v18  ;;  %1194 = vst [vmem:[#allocation2 + $0x10] sm:$0xc] %v1190_v16  ;;  %v2948_v7 = vrot.slane %v2516_v28, %v1963_v32  ;;  %v1215_v33 = vmul.f32 %v1211_v3, %v1201_v30  ;;  %v814_v54 = vadd.f32 %v749_v8, %v690_v25  ;;  %v1071_v48 = vpop.permute.xlu0 %1070 }
 0x351   :  { %1195 = vst [vmem:[#allocation2 + $0x18] sm:$0xc] %v1191_v63  ;;  %v815_v50 = vadd.f32 %v750_v57, %v691_v61  ;;  %v2949_v39 = vrot.slane %v2483_v37, %v1963_v32  ;;  %v2950_v23 = vrot.slane %v2483_v37, %v2220_v9  ;;  %v816_v27 = vadd.f32 %v812_v21, %v810_v38 }
 0x352   :  { %v1214_v51 = vmul.f32 %v2948_v7, %v1200_v22  ;;  %v817_v24 = vadd.f32 %v813_v34, %v811_v47  ;;  %v1219_v6 = vrot.slane %v1215_v33, 4  ;;  %v1072_v28 = vsel %vm259_vm2, %v1069_v55, %v1071_v48 }
 0x353   :  { %v808_v56 = vmul.f32 %v2949_v39, %v787_v2  ;;  %v809_v18 = vmul.f32 %v2950_v23, %v794_v59  ;;  %v1073_v3 = vsel %vm259_vm2, %v1071_v48, %v1069_v55  ;;  %v1087_v52 = vmul.f32 %v1083_v15, %v1072_v28  ;;  %v1690_v15 = vld [vmem:[%s2909_s6 + $0x4] ss:$8 sm:$0x3] }
 0x354   :  { %v1218_v19 = vrot.slane %v1214_v51, 4  ;;  %1223 = vst [vmem:[#allocation2 + $0x18] sm:$0x30] %v1219_v6  ;;  %v1086_v37 = vmul.f32 %v1079_v17, %v1073_v3  ;;  %v1157_v8 = vrot.slane %v1690_v15, %v1963_v32  ;;  %v1161_v4 = vrot.slane %v1690_v15, %v2220_v9  ;;  %v2951_v39 = vld [vmem:[#allocation7_spill] sm:$0xff] }
 0x355   :  { %v818_v5 = vadd.f32 %v814_v54, %v808_v56  ;;  %v819_v11 = vadd.f32 %v815_v50, %v809_v18  ;;  %1089 = vst [vmem:[#allocation2 + $0x8] sm:$0x3] %v1087_v52 }
 0x356   :  { %1222 = vst [vmem:[#allocation2 + $0x10] sm:$0x30] %v1218_v19  ;;  %1088 = vst [vmem:[#allocation2] sm:$0x3] %v1086_v37 }
 0x357   :  { %v820_v60 = vadd.f32 %v818_v5, %v816_v27  ;;  %v821_v44 = vadd.f32 %v819_v11, %v817_v24 }
 0x359   :  { %v823_v62 = vadd.f32 %v2650_v58, %v820_v60  ;;  %v824_v21 = vadd.f32 %v2650_v58, %v821_v44  ;;  %v2660_v10 = vpop.permute.xlu1 %1300 }
 0x35b   :  { %v825_v34 = vmul.f32 0.5, %v823_v62  ;;  %v826_v53 = vmul.f32 0.5, %v824_v21 }
 0x35c   :  { %v2666_v26 = vld [vmem:[#allocation2 + $0x8] sm:$0xff] }
 0x35d   :  { %1746 = vtanh.f32 %v825_v34  ;;  %v2662_v17 = vld [vmem:[#allocation2] sm:$0xff]  ;;  %v2673_v12 = vpop.permute.xlu1 %1356 }
 0x35e   :  { %1748 = vtanh.f32 %v826_v53  ;;  %1228 = vrot.lane.b32.xlu1 %v2662_v17, %s1787_s10 }
 0x361   :  { %v2675_v31 = vpop.permute.xlu0 %1305  ;;  %v2685_v63 = vpop.permute.xlu1 %1442 }
 0x362   :  { %1232 = vrot.lane.b32.xlu1 %v2666_v26, %s1787_s10 }
 0x365   :  { %v1149_v35 = vpop.permute.xlu0 %1148 }
 0x366   :  { %1284 = vrot.lane.b32.xlu1 %v2662_v17, %s1788_s2  ;;  %v1150_v36 = vsel %vm342_vm5, %v1147_v20, %v1149_v35  ;;  %v1151_v61 = vsel %vm342_vm5, %v1149_v35, %v1147_v20 }
 0x367   :  { %v1747_v29 = vpop.eup %1746  ;;  %v1164_v14 = vmul.f32 %v1157_v8, %v1150_v36  ;;  %v1165_v2 = vmul.f32 %v1161_v4, %v1151_v61 }
 0x368   :  { %v1749_v57 = vpop.eup %1748  ;;  %v829_v0 = vmul.f32 0.5, %v1747_v29 }
 0x369   :  { %v830_v49 = vmul.f32 0.5, %v1749_v57  ;;  %1166 = vst [vmem:[#allocation2 + $0x10] sm:$0x3] %v1164_v14  ;;  %1167 = vst [vmem:[#allocation2 + $0x18] sm:$0x3] %v1165_v2  ;;  %v2691_v30 = vpop.permute.xlu0 %1361  ;;  %v2952_v2 = vld [vmem:[#allocation17_spill] sm:$0xff] }
 0x36a   :  { %v831_v25 = vadd.f32 0.5, %v829_v0  ;;  %1288 = vrot.lane.b32.xlu1 %v2666_v26, %s1788_s2 }
 0x36b   :  { %v832_v16 = vadd.f32 0.5, %v830_v49 }
 0x36c   :  { %v836_v59 = vrot.slane %v831_v25, %v1963_v32 }
 0x36d   :  { %v840_v22 = vrot.slane %v832_v16, %v1963_v32 }
 0x36e   :  { %v841_v38 = vmul.f32 %v836_v59, %v2087_v42  ;;  %v843_v47 = vmul.f32 %v836_v59, %v2081_v40  ;;  %v845_v7 = vmul.f32 %v836_v59, %v2093_v45  ;;  %v847_v51 = vmul.f32 %v836_v59, %v2105_v1  ;;  %1340 = vrot.lane.b32.xlu1 %v2662_v17, %s1789_s3  ;;  %v2703_v40 = vpop.permute.xlu1 %1498  ;;  %v2705_v42 = vpop.permute.xlu0 %1447 }
 0x36f   :  { %v842_v33 = vmul.f32 %v840_v22, %v2090_v43  ;;  %v844_v54 = vmul.f32 %v840_v22, %v2084_v41  ;;  %v846_v50 = vmul.f32 %v840_v22, %v2096_v46  ;;  %v848_v56 = vmul.f32 %v840_v22, %v2951_v39  ;;  %v2953_v39 = vld [vmem:[#allocation16_spill] sm:$0xff] }
 0x370   :  { %849 = vst [vmem:[#allocation4] sm:$0xff] %v841_v38  ;;  %851 = vst [vmem:[#allocation4 + $0x10] sm:$0xff] %v843_v47  ;;  %v1226_v41 = vld [vmem:[#allocation2 + $0x10] sm:$0xff]  ;;  %v1227_v46 = vld [vmem:[#allocation2 + $0x18] sm:$0xff] }
 0x371   :  { %853 = vst [vmem:[#allocation4 + $0x20] sm:$0xff] %v845_v7  ;;  %855 = vst [vmem:[#allocation4 + $0x30] sm:$0xff] %v847_v51  ;;  %1230 = vrot.lane.b32.xlu0 %v1226_v41, %s1787_s10 }
 0x372   :  { %850 = vst [vmem:[#allocation4 + $0x8] sm:$0xff] %v842_v33  ;;  %852 = vst [vmem:[#allocation4 + $0x18] sm:$0xff] %v844_v54  ;;  %1344 = vrot.lane.b32.xlu1 %v2666_v26, %s1789_s3  ;;  %v2710_v43 = vpop.permute.xlu0 %1503  ;;  %v1401_v45 = vpop.permute.xlu1 %1400 }
 0x373   :  { %854 = vst [vmem:[#allocation4 + $0x28] sm:$0xff] %v846_v50  ;;  %856 = vst [vmem:[#allocation4 + $0x38] sm:$0xff] %v848_v56  ;;  %v1408_v23 = vmul.f32 %v1401_v45, %v2662_v17  ;;  %v1409_v18 = vmul.f32 %v1401_v45, %v2666_v26 }
 0x375   :  { %1234 = vrot.lane.b32.xlu0 %v1227_v46, %s1787_s10 }
 0x376   :  { %1426 = vrot.lane.b32.xlu1 %v2662_v17, %s1790_s11  ;;  %v1406_v1 = vpop.permute.xlu0 %1405  ;;  %v2737_v6 = vpop.permute.xlu1 %1554 }
 0x377   :  { %v1410_v27 = vmul.f32 %v1406_v1, %v1226_v41  ;;  %v1411_v24 = vmul.f32 %v1406_v1, %v1227_v46 }
 0x379   :  { %v1412_v55 = vadd.f32 %v1410_v27, %v1408_v23  ;;  %v1419_v19 = vadd.f32 %v1411_v24, %v1409_v18  ;;  %1286 = vrot.lane.b32.xlu0 %v1226_v41, %s1788_s2 }
 0x37a   :  { %1430 = vrot.lane.b32.xlu1 %v2666_v26, %s1790_s11  ;;  %v2739_v3 = vpop.permute.xlu0 %1559 }
 0x37b   :  { %v1420_v34 = vrot.slane %v1419_v19, 4  ;;  %v1413_v20 = vrot.slane %v1412_v55, 4 }
 0x37d   :  { %1290 = vrot.lane.b32.xlu0 %v1227_v46, %s1788_s2  ;;  %v1414_v29 = vadd.f32 %v1413_v20, %v1412_v55 }
 0x37e   :  { %1482 = vrot.lane.b32.xlu1 %v2662_v17, %s1791_s12 }
 0x37f   :  { %v1415_v25 = vrot.slane %v1414_v29, 2 }
 0x381   :  { %1342 = vrot.lane.b32.xlu0 %v1226_v41, %s1789_s3 }
 0x382   :  { %1486 = vrot.lane.b32.xlu1 %v2666_v26, %s1791_s12 }
 0x385   :  { %1346 = vrot.lane.b32.xlu0 %v1227_v46, %s1789_s3 }
 0x386   :  { %1538 = vrot.lane.b32.xlu1 %v2662_v17, %s1792_s13  ;;  %v1421_v17 = vadd.f32 %v1420_v34, %v1419_v19 }
 0x388   :  { %v1422_v4 = vrot.slane %v1421_v17, 2 }
 0x389   :  { %1428 = vrot.lane.b32.xlu0 %v1226_v41, %s1790_s11 }
 0x38a   :  { %1542 = vrot.lane.b32.xlu1 %v2666_v26, %s1792_s13  ;;  %v2760_v7 = vadd.f32 %v1422_v4, %v1421_v17 }
 0x38d   :  { %1432 = vrot.lane.b32.xlu0 %v1227_v46, %s1790_s11 }
 0x391   :  { %1484 = vrot.lane.b32.xlu0 %v1226_v41, %s1791_s12 }
 0x395   :  { %1488 = vrot.lane.b32.xlu0 %v1227_v46, %s1791_s12 }
 0x399   :  { %1540 = vrot.lane.b32.xlu0 %v1226_v41, %s1792_s13 }
 0x39d   :  { %1544 = vrot.lane.b32.xlu0 %v1227_v46, %s1792_s13 }
 0x3d0   :  { %v1229_v48 = vpop.permute.xlu1 %1228 }
 0x3d4   :  { %v1233_v5 = vpop.permute.xlu1 %1232 }
 0x3d5   :  { %v1238_v36 = vsel %vm434_vm8, %v1233_v5, %v1229_v48  ;;  %v1236_v51 = vsel %vm434_vm8, %v1229_v48, %v1233_v5 }
 0x3d6   :  { %v1252_v56 = vmul.f32 %v2953_v39, %v1238_v36 }
 0x3d8   :  { %v1285_v11 = vpop.permute.xlu1 %1284 }
 0x3dc   :  { %v1289_v28 = vpop.permute.xlu1 %1288 }
 0x3dd   :  { %v1292_v41 = vsel %vm492_vm9, %v1285_v11, %v1289_v28  ;;  %v1294_v45 = vsel %vm492_vm9, %v1289_v28, %v1285_v11 }
 0x3de   :  { %v1308_v48 = vmul.f32 %v2660_v10, %v1294_v45  ;;  %v1309_v5 = vmul.f32 %v2660_v10, %v1292_v41 }
 0x3e0   :  { %v1341_v37 = vpop.permute.xlu1 %1340 }
 0x3e3   :  { %v1231_v52 = vpop.permute.xlu0 %1230 }
 0x3e4   :  { %v1345_v60 = vpop.permute.xlu1 %1344 }
 0x3e5   :  { %v1348_v8 = vsel %vm551_vm10, %v1341_v37, %v1345_v60  ;;  %v1350_v61 = vsel %vm551_vm10, %v1345_v60, %v1341_v37 }
 0x3e6   :  { %v1365_v16 = vmul.f32 %v2673_v12, %v1348_v8  ;;  %v1364_v1 = vmul.f32 %v2673_v12, %v1350_v61 }
 0x3e7   :  { %v1235_v44 = vpop.permute.xlu0 %1234 }
 0x3e8   :  { %v1427_v21 = vpop.permute.xlu1 %1426  ;;  %v1239_v57 = vsel %vm434_vm8, %v1235_v44, %v1231_v52  ;;  %v1237_v33 = vsel %vm434_vm8, %v1231_v52, %v1235_v44 }
 0x3e9   :  { %v1254_v59 = vmul.f32 %v2952_v2, %v1239_v57  ;;  %v1255_v24 = vmul.f32 %v2952_v2, %v1237_v33  ;;  %v2803_v57 = vld [vmem:[%s2909_s6 + $0x11] ss:$8 sm:$0x3]  ;;  %v1424_v2 = vrot.slane %v2760_v7, 1 }
 0x3ea   :  { %v1391_v33 = vrot.slane %v2803_v57, %v2220_v9 }
 0x3eb   :  { %v1287_v62 = vpop.permute.xlu0 %1286  ;;  %v1256_v55 = vadd.f32 %v1254_v59, %v1252_v56 }
 0x3ec   :  { %v1431_v26 = vpop.permute.xlu1 %1430 }
 0x3ed   :  { %v1434_v23 = vsel %vm641_vm11, %v1427_v21, %v1431_v26  ;;  %v1436_v12 = vsel %vm641_vm11, %v1431_v26, %v1427_v21  ;;  %v1257_v20 = vrot.slane %v1256_v55, 4 }
 0x3ee   :  { %v1450_v52 = vmul.f32 %v2685_v63, %v1434_v23  ;;  %v1451_v26 = vmul.f32 %v2685_v63, %v1436_v12 }
 0x3ef   :  { %v1291_v53 = vpop.permute.xlu0 %1290 }
 0x3f0   :  { %v1483_v14 = vpop.permute.xlu1 %1482  ;;  %v1293_v22 = vsel %vm492_vm9, %v1287_v62, %v1291_v53  ;;  %v1295_v38 = vsel %vm492_vm9, %v1291_v53, %v1287_v62 }
 0x3f1   :  { %v1310_v18 = vmul.f32 %v2675_v31, %v1295_v38  ;;  %v1311_v27 = vmul.f32 %v2675_v31, %v1293_v22  ;;  %v2786_v31 = vld [vmem:[%s2909_s6 + $0x7] ss:$8 sm:$0x3] }
 0x3f2   :  { %v1275_v8 = vrot.slane %v2786_v31, %v1963_v32  ;;  %v1279_v4 = vrot.slane %v2786_v31, %v2220_v9 }
 0x3f3   :  { %v1343_v15 = vpop.permute.xlu0 %1342  ;;  %v1312_v62 = vadd.f32 %v1310_v18, %v1308_v48  ;;  %v1319_v34 = vadd.f32 %v1311_v27, %v1309_v5 }
 0x3f4   :  { %v1487_v11 = vpop.permute.xlu1 %1486 }
 0x3f5   :  { %v1492_v63 = vsel %vm700_vm12, %v1487_v11, %v1483_v14  ;;  %v1313_v59 = vrot.slane %v1312_v62, 4  ;;  %v1320_v22 = vrot.slane %v1319_v34, 4 }
 0x3f7   :  { %v1347_v0 = vpop.permute.xlu0 %1346  ;;  %v1314_v23 = vadd.f32 %v1313_v59, %v1312_v62  ;;  %v1321_v18 = vadd.f32 %v1320_v22, %v1319_v34 }
 0x3f8   :  { %v1349_v49 = vsel %vm551_vm10, %v1343_v15, %v1347_v0  ;;  %v1351_v35 = vsel %vm551_vm10, %v1347_v0, %v1343_v15  ;;  %v1539_v38 = vpop.permute.xlu1 %1538 }
 0x3f9   :  { %v1367_v47 = vmul.f32 %v2691_v30, %v1349_v49  ;;  %v1366_v54 = vmul.f32 %v2691_v30, %v1351_v35  ;;  %v1253_v30 = vmul.f32 %v2953_v39, %v1236_v51  ;;  %v1507_v39 = vmul.f32 %v2703_v40, %v1492_v63 }
 0x3fb   :  { %v1429_v50 = vpop.permute.xlu0 %1428  ;;  %v1375_v46 = vadd.f32 %v1367_v47, %v1365_v16  ;;  %v1368_v28 = vadd.f32 %v1366_v54, %v1364_v1  ;;  %v1263_v17 = vadd.f32 %v1255_v24, %v1253_v30  ;;  %v2809_v16 = vadd.f32 %v1415_v25, %v1414_v29  ;;  %v2819_v29 = vld [vmem:[%s2909_s6 + $0x10] ss:$8 sm:$0x3] }
 0x3fc   :  { %v1258_v47 = vadd.f32 %v1257_v20, %v1256_v55  ;;  %v1425_v30 = vadd.f32 %v1424_v2, %v2760_v7  ;;  %v1331_v48 = vrot.slane %v2819_v29, %v1963_v32  ;;  %v1543_v12 = vpop.permute.xlu1 %1542  ;;  %v1322_v7 = vrot.slane %v1321_v18, 2 }
 0x3fd   :  { %v1376_v19 = vrot.slane %v1375_v46, 4  ;;  %v1369_v0 = vrot.slane %v1368_v28, 4  ;;  %v1264_v51 = vrot.slane %v1263_v17, 4 }
 0x3fe   :  { %v1259_v24 = vrot.slane %v1258_v47, 2  ;;  %v1323_v59 = vadd.f32 %v1322_v7, %v1321_v18  ;;  %v1387_v18 = vrot.slane %v2803_v57, %v1963_v32 }
 0x3ff   :  { %v1433_v37 = vpop.permute.xlu0 %1432  ;;  %v1377_v60 = vadd.f32 %v1376_v19, %v1375_v46  ;;  %v1265_v55 = vadd.f32 %v1264_v51, %v1263_v17  ;;  %v1546_v17 = vsel %vm759_vm13, %v1539_v38, %v1543_v12 }
 0x400   :  { %v1435_v44 = vsel %vm641_vm11, %v1429_v50, %v1433_v37  ;;  %v1437_v10 = vsel %vm641_vm11, %v1433_v37, %v1429_v50  ;;  %v1562_v51 = vmul.f32 %v2737_v6, %v1546_v17 }
 0x401   :  { %v1452_v21 = vmul.f32 %v2705_v42, %v1435_v44  ;;  %v1453_v53 = vmul.f32 %v2705_v42, %v1437_v10  ;;  %v1378_v15 = vrot.slane %v1377_v60, 2  ;;  %v1490_v42 = vsel %vm700_vm12, %v1483_v14, %v1487_v11 }
 0x402   :  { %v1506_v50 = vmul.f32 %v2703_v40, %v1490_v42  ;;  %v1370_v14 = vadd.f32 %v1369_v0, %v1368_v28  ;;  %v1315_v10 = vrot.slane %v1314_v23, 2  ;;  %v1266_v20 = vrot.slane %v1265_v55, 2 }
 0x403   :  { %v1454_v49 = vadd.f32 %v1452_v21, %v1450_v52  ;;  %v1485_v35 = vpop.permute.xlu0 %1484  ;;  %v1379_v36 = vadd.f32 %v1378_v15, %v1377_v60  ;;  %v1461_v61 = vadd.f32 %v1453_v53, %v1451_v26  ;;  %v1335_v52 = vrot.slane %v2819_v29, %v2220_v9 }
 0x404   :  { %v1371_v5 = vrot.slane %v1370_v14, 2  ;;  %v1417_v21 = vrot.slane %v2809_v16, 1  ;;  %v1260_v53 = vadd.f32 %v1259_v24, %v1258_v47  ;;  %v1548_v15 = vsel %vm759_vm13, %v1543_v12, %v1539_v38 }
 0x405   :  { %v1380_v54 = vrot.slane %v1379_v36, 1  ;;  %v1455_v56 = vrot.slane %v1454_v49, 4  ;;  %v1462_v45 = vrot.slane %v1461_v61, 4  ;;  %v1316_v2 = vadd.f32 %v1315_v10, %v1314_v23 }
 0x406   :  { %v1372_v26 = vadd.f32 %v1371_v5, %v1370_v14  ;;  %v1473_v12 = vrot.slane %v1704_v13, %v1963_v32 }
 0x407   :  { %v1489_v41 = vpop.permute.xlu0 %1488  ;;  %v1381_v25 = vadd.f32 %v1380_v54, %v1379_v36  ;;  %v1456_v44 = vadd.f32 %v1455_v56, %v1454_v49  ;;  %v1317_v23 = vrot.slane %v1316_v2, 1 }
 0x408   :  { %v1491_v46 = vsel %vm700_vm12, %v1485_v35, %v1489_v41  ;;  %v1493_v1 = vsel %vm700_vm12, %v1489_v41, %v1485_v35 }
 0x409   :  { %v1508_v40 = vmul.f32 %v2710_v43, %v1491_v46  ;;  %v1509_v27 = vmul.f32 %v2710_v43, %v1493_v1  ;;  %v1395_v19 = vmul.f32 %v1391_v33, %v1381_v25  ;;  %v1463_v43 = vadd.f32 %v1462_v45, %v1461_v61 }
 0x40a   :  { %v1457_v49 = vrot.slane %v1456_v44, 2  ;;  %v1563_v33 = vmul.f32 %v2737_v6, %v1548_v15  ;;  %v1418_v1 = vadd.f32 %v1417_v21, %v2809_v16  ;;  %v1324_v6 = vrot.slane %v1323_v59, 1 }
 0x40b   :  { %v1510_v11 = vadd.f32 %v1508_v40, %v1506_v50  ;;  %v1517_v28 = vadd.f32 %v1509_v27, %v1507_v39  ;;  %v1541_v37 = vpop.permute.xlu0 %1540  ;;  %v2832_v60 = vadd.f32 %v1425_v30, %v1395_v19  ;;  %v1464_v63 = vrot.slane %v1463_v43, 2 }
 0x40c   :  { %v1267_v50 = vadd.f32 %v1266_v20, %v1265_v55  ;;  %v1373_v39 = vrot.slane %v1372_v26, 1  ;;  %v1458_v41 = vadd.f32 %v1457_v49, %v1456_v44  ;;  %v1261_v55 = vrot.slane %v1260_v53, 1 }
 0x40d   :  { %v1511_v62 = vrot.slane %v1510_v11, 4  ;;  %v1518_v34 = vrot.slane %v1517_v28, 4  ;;  %v1465_v25 = vadd.f32 %v1464_v63, %v1463_v43  ;;  %v1318_v44 = vadd.f32 %v1317_v23, %v1316_v2 }
 0x40e   :  { %v1268_v19 = vrot.slane %v1267_v50, 1  ;;  %v1374_v5 = vadd.f32 %v1373_v39, %v1372_v26  ;;  %v1325_v43 = vadd.f32 %v1324_v6, %v1323_v59  ;;  %v1262_v17 = vadd.f32 %v1261_v55, %v1260_v53 }
 0x40f   :  { %v1512_v0 = vadd.f32 %v1511_v62, %v1510_v11  ;;  %v1519_v35 = vadd.f32 %v1518_v34, %v1517_v28  ;;  %v1545_v42 = vpop.permute.xlu0 %1544  ;;  %v1459_v11 = vrot.slane %v1458_v41, 1  ;;  %v1466_v16 = vrot.slane %v1465_v25, 1  ;;  %v1710_v34 = vld [vmem:[%s2909_s6 + $0x15] ss:$8 sm:$0x3] }
 0x410   :  { %v1547_v36 = vsel %vm759_vm13, %v1541_v37, %v1545_v42  ;;  %v1549_v61 = vsel %vm759_vm13, %v1545_v42, %v1541_v37  ;;  %v1269_v26 = vadd.f32 %v1268_v19, %v1267_v50  ;;  %v1394_v15 = vmul.f32 %v1387_v18, %v1374_v5  ;;  %v2954_v5 = vld [vmem:[#allocation8_spill] sm:$0xff] }
 0x411   :  { %v1513_v22 = vrot.slane %v1512_v0, 2  ;;  %v1520_v47 = vrot.slane %v1519_v35, 2  ;;  %v1564_v38 = vmul.f32 %v2739_v3, %v1547_v36  ;;  %v1565_v54 = vmul.f32 %v2739_v3, %v1549_v61  ;;  %v1707_v3 = vld [vmem:[%s2909_s6 + $0x14] ss:$8 sm:$0x3]  ;;  %s1793_s6 = smov [#allocation4]  }
 0x412   :  { %v1529_v57 = vrot.slane %v1707_v3, %v1963_v32  ;;  %v1533_v10 = vrot.slane %v1707_v3, %v2220_v9  ;;  %v1467_v42 = vadd.f32 %v1466_v16, %v1465_v25  ;;  %v1338_v36 = vmul.f32 %v1331_v48, %v1318_v44  ;;  %s1646_s21 = sshll.u32 %s1793_s6, 4  ;;  %v2956_v16 = vld [vmem:[#allocation12_spill] sm:$0xff]  ;;  %s1647_s21 = int_to_ptr.vmem [resolvable:$true] %s1646_s21 }
 0x413   :  { %v1514_v14 = vadd.f32 %v1513_v22, %v1512_v0  ;;  %v1521_v56 = vadd.f32 %v1520_v47, %v1519_v35  ;;  %v1566_v45 = vadd.f32 %v1564_v38, %v1562_v51  ;;  %v1573_v46 = vadd.f32 %v1565_v54, %v1563_v33  ;;  %s1754_s1 = scalar_lea.vmem %s1647_s21, 2048  ;;  %p1759_p1 = scmp.lt.s32.totalorder %s1647_s21, %s1647_s21 }
 0x414   :  { %v1477_v0 = vrot.slane %v1704_v13, %v2220_v9  ;;  %v1460_v35 = vadd.f32 %v1459_v11, %v1458_v41  ;;  %v1339_v61 = vmul.f32 %v1335_v52, %v1325_v43  ;;  %v1585_v2 = vrot.slane %v1710_v34, %v1963_v32  ;;  %v2955_v11 = vld [vmem:[#allocation10_spill] sm:$0xff]  ;;  %v2958_v43 = vld [vmem:[#allocation9_spill] sm:$0xff]  ;;  %p1755_p0 = scmp.ne.s32.totalorder %s1647_s21, %s1754_s1  ;;  %p1760_p2 = scmp.lt.s32.totalorder %s1754_s1, %s1754_s1 }
 0x415   :  { %v1515_v40 = vrot.slane %v1514_v14, 1  ;;  %v1522_v27 = vrot.slane %v1521_v56, 1  ;;  %v1567_v30 = vrot.slane %v1566_v45, 4  ;;  %v1574_v24 = vrot.slane %v1573_v46, 4 }
 0x416   :  { %v1589_v53 = vrot.slane %v1710_v34, %v2220_v9  ;;  %v1282_v33 = vmul.f32 %v1275_v8, %v1262_v17  ;;  %v1283_v48 = vmul.f32 %v1279_v4, %v1269_v26  ;;  %v1596_v38 = vadd.f32 %v1418_v1, %v1394_v15  ;;  %p1761_p3 = por %p1760_p2, %p1759_p1 }
 0x417   :  { %v1568_v28 = vadd.f32 %v1567_v30, %v1566_v45  ;;  %v1575_v37 = vadd.f32 %v1574_v24, %v1573_v46  ;;  %v1516_v7 = vadd.f32 %v1515_v40, %v1514_v14  ;;  %v1523_v62 = vadd.f32 %v1522_v27, %v1521_v56 }
 0x418   :  { %v1480_v54 = vmul.f32 %v1473_v12, %v1460_v35  ;;  %v1481_v29 = vmul.f32 %v1477_v0, %v1467_v42  ;;  %v1594_v39 = vadd.f32 %v1338_v36, %v1282_v33  ;;  %v1595_v14 = vadd.f32 %v1339_v61, %v1283_v48  ;;  %p1762_p4 = pnand %p1761_p3, %p1755_p0 }
 0x419   :  { %v1569_v21 = vrot.slane %v1568_v28, 2  ;;  %v1576_v20 = vrot.slane %v1575_v37, 2  ;;  %v1536_v59 = vmul.f32 %v1529_v57, %v1516_v7  ;;  %v1537_v22 = vmul.f32 %v1533_v10, %v1523_v62  ;;  %v2959_v10 = vld [vmem:[#allocation11_spill] sm:$0xff]  ;;  %v2960_v62 = vld [vmem:[#allocation13_spill] sm:$0xff] }
 0x41a   :  { %v1600_v45 = vadd.f32 %v1596_v38, %v1594_v39  ;;  %v1601_v46 = vadd.f32 %v2832_v60, %v1595_v14 }
 0x41b   :  { %v1570_v49 = vadd.f32 %v1569_v21, %v1568_v28  ;;  %v1577_v63 = vadd.f32 %v1576_v20, %v1575_v37  ;;  %v1598_v56 = vadd.f32 %v1536_v59, %v1480_v54  ;;  %v1599_v13 = vadd.f32 %v1537_v22, %v1481_v29  ;;  %v2957_v37 = vld [vmem:[#allocation14_spill] sm:$0xff]  ;;  %v2961_v21 = vld [vmem:[#allocation15_spill] sm:$0xff] }
 0x41d   :  { %v1571_v47 = vrot.slane %v1570_v49, 1  ;;  %v1578_v51 = vrot.slane %v1577_v63, 1 }
 0x41f   :  { %v1572_v52 = vadd.f32 %v1571_v47, %v1570_v49  ;;  %v1579_v50 = vadd.f32 %v1578_v51, %v1577_v63 }
 0x421   :  { %v1592_v41 = vmul.f32 %v1585_v2, %v1572_v52  ;;  %v1593_v25 = vmul.f32 %v1589_v53, %v1579_v50 }
 0x423   :  { %v1602_v23 = vadd.f32 %v1598_v56, %v1592_v41  ;;  %v1603_v8 = vadd.f32 %v1599_v13, %v1593_v25 }
 0x425   :  { %v1604_v6 = vadd.f32 %v1602_v23, %v1600_v45  ;;  %v1605_v18 = vadd.f32 %v1603_v8, %v1601_v46 }
 0x427   :  { %v1606_v9 = vadd.f32 %v1604_v6, %v2650_v58  ;;  %v1607_v31 = vadd.f32 %v1605_v18, %v2650_v58 }
 0x429   :  { %v1608_v4 = vmul.f32 0.5, %v1606_v9  ;;  %v1609_v1 = vmul.f32 0.5, %v1607_v31 }
 0x42b   :  { %1750 = vtanh.f32 %v1608_v4 }
 0x42c   :  { %1752 = vtanh.f32 %v1609_v1 }
 0x435   :  { %v1751_v3 = vpop.eup %1750 }
 0x436   :  { %v1753_v40 = vpop.eup %1752  ;;  %v1612_v27 = vmul.f32 0.5, %v1751_v3 }
 0x437   :  { %v1613_v30 = vmul.f32 0.5, %v1753_v40 }
 0x438   :  { %v1614_v24 = vadd.f32 0.5, %v1612_v27 }
 0x439   :  { %v1615_v55 = vadd.f32 0.5, %v1613_v30 }
 0x43a   :  { %v1619_v60 = vrot.slane %v1614_v24, %v1963_v32 }
 0x43b   :  { %v1623_v19 = vrot.slane %v1615_v55, %v1963_v32 }
 0x43c   :  { %v1624_v12 = vmul.f32 %v1619_v60, %v2954_v5  ;;  %v1626_v58 = vmul.f32 %v1619_v60, %v2955_v11  ;;  %v1628_v28 = vmul.f32 %v1619_v60, %v2956_v16  ;;  %v1630_v44 = vmul.f32 %v1619_v60, %v2957_v37 }
 0x43d   :  { %v1625_v57 = vmul.f32 %v1623_v19, %v2958_v43  ;;  %v1627_v7 = vmul.f32 %v1623_v19, %v2959_v10  ;;  %v1629_v34 = vmul.f32 %v1623_v19, %v2960_v62  ;;  %v1631_v20 = vmul.f32 %v1623_v19, %v2961_v21 }
 0x43e   :  { %1633 = vst [vmem:[#allocation4 + $0x40] sm:$0xff] %v1624_v12  ;;  %1635 = vst [vmem:[#allocation4 + $0x50] sm:$0xff] %v1626_v58 }
 0x43f   :  { %1637 = vst [vmem:[#allocation4 + $0x60] sm:$0xff] %v1628_v28  ;;  %1639 = vst [vmem:[#allocation4 + $0x70] sm:$0xff] %v1630_v44 }
 0x440   :  { %1634 = vst [vmem:[#allocation4 + $0x48] sm:$0xff] %v1625_v57  ;;  %1636 = vst [vmem:[#allocation4 + $0x58] sm:$0xff] %v1627_v7 }
 0x441   :  { %1638 = vst [vmem:[#allocation4 + $0x68] sm:$0xff] %v1629_v34  ;;  %1640 = vst [vmem:[#allocation4 + $0x78] sm:$0xff] %v1631_v20 }
 0x442   :  { %1765 = shalt.err (!%p1762_p4)
}
 0x443   :  { %s1766_s24 = scalar_lea.hbm %s2911_s8, 2048 }
 0x444   :  { %p1767_p5 = scmp.ne.s32.totalorder %s2911_s8, %s1766_s24  ;;  %p1770_p6 = scmp.lt.u32.totalorder %s1766_s24, %s2911_s8 }
 0x446   :  { %p1772_p7 = pnand %p1770_p6, %p1767_p5 }
 0x448   :  { %1775 = shalt.err (!%p1772_p7)
}
 0x449   :  { %s1794_s29 = smov 256  }
 0x44a   :  { %1652 = dma.vmem_to_hbm [thread:$0]  %s1647_s21, 2048, %s2911_s8, [#allocation5], %s1794_s29, %s1794_s29, %s1789_s3  }
 0x44b   :  { %1776 = dma.done.wait [#allocation5], 2048  }
 0x44c   :  { %1777 = vsyncadd [#allocation5], 4294965248 }
 0x44d   :  { %1656 = vsyncpa [#allocation5], 1 }

</bundles_post_ra>
